<compile_context>
chip_gen: v7x
topology: tpu7x:2x2x1
jax: 0.10.0
libtpu: 0.0.40
codegen_flags: <defaults>
</compile_context>

<pallas_src>
import jax
import jax.numpy as jnp
import numpy as np
from jax.experimental import pallas as pl
from jax.experimental.pallas import tpu as pltpu

BN_EPS = 1e-5
LANE = 128


def _round_up(x, m):
    return (x + m - 1) // m * m


# --------------------------- TPU-generation tuning ---------------------------

_VMEM_LIMIT_CACHE = None


def _vmem_limit_bytes():
    global _VMEM_LIMIT_CACHE
    if _VMEM_LIMIT_CACHE is None:
        try:
            cap = int(pltpu.get_tpu_info().vmem_capacity_bytes)
            if cap >= 128 * 1024 * 1024:
                _VMEM_LIMIT_CACHE = 96 * 1024 * 1024   # v5e / v6e (128 MiB parts)
            else:
                _VMEM_LIMIT_CACHE = 32 * 1024 * 1024   # v7x (64 MiB part)
        except Exception:
            _VMEM_LIMIT_CACHE = 32 * 1024 * 1024       # safe everywhere
    return _VMEM_LIMIT_CACHE


def _compiler_params():
    return pltpu.CompilerParams(
        dimension_semantics=("parallel",),       # batch grid axis -> megacore
        vmem_limit_bytes=_vmem_limit_bytes(),
    )


# Resident-weight BlockSpec: constant index_map; single-buffered (saves VMEM on
# v7x for deep layers) when pl.Buffered(1) is accepted by this JAX version.
_BUF1_OK = None


def _buffered_one_supported():
    global _BUF1_OK
    if _BUF1_OK is None:
        try:
            def _copy(x_ref, o_ref):
                o_ref[...] = x_ref[...]
            f = pl.pallas_call(
                _copy,
                out_shape=jax.ShapeDtypeStruct((8, 128), jnp.float32),
                grid=(1,),
                in_specs=[pl.BlockSpec((8, 128), lambda i: (0, 0),
                                       pipeline_mode=pl.Buffered(1))],
                out_specs=pl.BlockSpec((8, 128), lambda i: (0, 0)),
                compiler_params=_compiler_params(),
            )
            x = jnp.arange(8 * 128, dtype=jnp.float32).reshape(8, 128)
            y = jax.block_until_ready(f(x))
            _BUF1_OK = bool(jnp.array_equal(y, x))
        except Exception:
            _BUF1_OK = False
    return _BUF1_OK


def _resident_spec(shape):
    idx = lambda n: (0,) * len(shape)
    if _buffered_one_supported():
        return pl.BlockSpec(shape, idx, pipeline_mode=pl.Buffered(1))
    return pl.BlockSpec(shape, idx)


# ------------------------------ Pallas passes --------------------------------

def _conv1_call(xph, w1p, wsp, *, stride, Ho, Wo):
    """3x3 conv1 tap accumulation + BN1 Welford partials + shortcut stats."""
    N = xph.shape[0]
    Hh, Wh, Cin = xph.shape[3], xph.shape[4], xph.shape[5]
    Cp = w1p.shape[-1]
    M = Ho * Wo

    def kernel(x_ref, w_ref, ws_ref, y_ref, m1_ref, v1_ref, ms_ref, vs_ref):
        acc = jnp.zeros((M, Cp), jnp.float32)
        for t in range(9):
            dy, dx = t // 3, t % 3
            tap = x_ref[0, dy % stride, dx % stride,
                        pl.ds(dy // stride, Ho), pl.ds(dx // stride, Wo), :]
            acc = acc + jnp.dot(tap.reshape(M, Cin), w_ref[t],
                                preferred_element_type=jnp.float32)
        inv = 1.0 / float(M)
        mean = jnp.sum(acc, axis=0, keepdims=True) * inv            # (1, Cp)
        d = acc - mean
        m1_ref[0] = mean
        v1_ref[0] = jnp.sum(d * d, axis=0, keepdims=True)
        # 1x1 shortcut statistics ride on the already-resident input tile
        # (otherwise-idle MXU); the residual itself is never written to HBM.
        sc = x_ref[0, 1 % stride, 1 % stride,
                   pl.ds(1 // stride, Ho), pl.ds(1 // stride, Wo), :]
        sacc = jnp.dot(sc.reshape(M, Cin), ws_ref[...],
                       preferred_element_type=jnp.float32)
        smean = jnp.sum(sacc, axis=0, keepdims=True) * inv
        sd = sacc - smean
        ms_ref[0] = smean
        vs_ref[0] = jnp.sum(sd * sd, axis=0, keepdims=True)
        # Raw conv1 output in bf16 (BN1 stats were taken from the f32 acc).
        y_ref[0] = acc.reshape(Ho, Wo, Cp).astype(jnp.bfloat16)

    stat = jax.ShapeDtypeStruct((N, 1, Cp), jnp.float32)
    return pl.pallas_call(
        kernel,
        out_shape=(jax.ShapeDtypeStruct((N, Ho, Wo, Cp), jnp.bfloat16),
                   stat, stat, stat, stat),
        grid=(N,),
        in_specs=[
            pl.BlockSpec((1, stride, stride, Hh, Wh, Cin),
                         lambda n: (n, 0, 0, 0, 0, 0)),
            _resident_spec(w1p.shape),
            _resident_spec(wsp.shape),
        ],
        out_specs=(
            pl.BlockSpec((1, Ho, Wo, Cp), lambda n: (n, 0, 0, 0)),
            pl.BlockSpec((1, 1, Cp), lambda n: (n, 0, 0)),
            pl.BlockSpec((1, 1, Cp), lambda n: (n, 0, 0)),
            pl.BlockSpec((1, 1, Cp), lambda n: (n, 0, 0)),
            pl.BlockSpec((1, 1, Cp), lambda n: (n, 0, 0)),
        ),
        compiler_params=_compiler_params(),
    )(xph, w1p, wsp)


def _conv2_call(y1, scale1, bias1, w2p):
    """BN1-apply + ReLU fused into the conv2 input read, 3x3 taps, BN2 stats."""
    N, Ho, Wo, Cp = y1.shape
    M = Ho * Wo

    def kernel(y_ref, s_ref, b_ref, w_ref, y2_ref, m_ref, v_ref):
        # BN1 affine + ReLU applied on the fly (out1 never round-trips HBM).
        a = jnp.maximum(y_ref[0].astype(jnp.float32) * s_ref[...] + b_ref[...],
                        0.0).astype(jnp.bfloat16)
        # In-VMEM zero padding (matches PyTorch zero padding of the activated
        # conv2 input), so every tap below is a contiguous static slice.
        zr = jnp.zeros((1, Wo, Cp), jnp.bfloat16)
        a = jnp.concatenate([zr, a, zr], axis=0)                 # (Ho+2, Wo, Cp)
        zc = jnp.zeros((Ho + 2, 1, Cp), jnp.bfloat16)
        a = jnp.concatenate([zc, a, zc], axis=1)                 # (Ho+2, Wo+2, Cp)
        acc = jnp.zeros((M, Cp), jnp.float32)
        for t in range(9):
            dy, dx = t // 3, t % 3
            tap = a[dy:dy + Ho, dx:dx + Wo, :].reshape(M, Cp)
            acc = acc + jnp.dot(tap, w_ref[t],
                                preferred_element_type=jnp.float32)
        inv = 1.0 / float(M)
        mean = jnp.sum(acc, axis=0, keepdims=True) * inv
        d = acc - mean
        m_ref[0] = mean
        v_ref[0] = jnp.sum(d * d, axis=0, keepdims=True)
        y2_ref[0] = acc.astype(jnp.bfloat16)

    stat = jax.ShapeDtypeStruct((N, 1, Cp), jnp.float32)
    return pl.pallas_call(
        kernel,
        out_shape=(jax.ShapeDtypeStruct((N, M, Cp), jnp.bfloat16), stat, stat),
        grid=(N,),
        in_specs=[
            pl.BlockSpec((1, Ho, Wo, Cp), lambda n: (n, 0, 0, 0)),
            pl.BlockSpec((1, Cp), lambda n: (0, 0)),
            pl.BlockSpec((1, Cp), lambda n: (0, 0)),
            _resident_spec(w2p.shape),
        ],
        out_specs=(
            pl.BlockSpec((1, M, Cp), lambda n: (n, 0, 0)),
            pl.BlockSpec((1, 1, Cp), lambda n: (n, 0, 0)),
            pl.BlockSpec((1, 1, Cp), lambda n: (n, 0, 0)),
        ),
        compiler_params=_compiler_params(),
    )(y1, scale1, bias1, w2p)


def _final_call(y2, xph, wsp, s2, b2, ss, bs, *, stride, Ho, Wo):
    """BN2-apply + in-kernel shortcut recompute + shortcut-BN + add + ReLU."""
    N, M, Cp = y2.shape
    Hh, Wh, Cin = xph.shape[3], xph.shape[4], xph.shape[5]

    def kernel(y_ref, x_ref, w_ref, s2_ref, b2_ref, ss_ref, bs_ref, o_ref):
        sc = x_ref[0, 1 % stride, 1 % stride,
                   pl.ds(1 // stride, Ho), pl.ds(1 // stride, Wo), :]
        resid = jnp.dot(sc.reshape(M, Cin), w_ref[...],
                        preferred_element_type=jnp.float32)
        out = y_ref[0].astype(jnp.float32) * s2_ref[...] + b2_ref[...]
        out = out + resid * ss_ref[...] + bs_ref[...]
        o_ref[0] = jnp.maximum(out, 0.0)

    # TODO(synk): emit bf16 / NHWC here if the downstream consumer accepts it
    # to halve the final write + transpose traffic (kept f32 NCHW-compatible
    # to match the PyTorch module contract).
    return pl.pallas_call(
        kernel,
        out_shape=jax.ShapeDtypeStruct((N, M, Cp), jnp.float32),
        grid=(N,),
        in_specs=[
            pl.BlockSpec((1, M, Cp), lambda n: (n, 0, 0)),
            pl.BlockSpec((1, stride, stride, Hh, Wh, Cin),
                         lambda n: (n, 0, 0, 0, 0, 0)),
            _resident_spec(wsp.shape),
            pl.BlockSpec((1, Cp), lambda n: (0, 0)),
            pl.BlockSpec((1, Cp), lambda n: (0, 0)),
            pl.BlockSpec((1, Cp), lambda n: (0, 0)),
            pl.BlockSpec((1, Cp), lambda n: (0, 0)),
        ],
        out_specs=pl.BlockSpec((1, M, Cp), lambda n: (n, 0, 0)),
        compiler_params=_compiler_params(),
    )(y2, xph, wsp, s2, b2, ss, bs)


# ------------------------------- glue (JAX) ----------------------------------

def _phase_decompose(x_nhwc, stride, compute_dtype):
    # Zero-pad spatially by 1 (3x3 conv, pad=1), cast bf16, then space-to-depth
    # by `stride` so every conv tap and the shortcut sample become contiguous
    # slices inside the kernels (no strided loads, no im2col).
    N, H, W, C = x_nhwc.shape
    xp = jnp.pad(x_nhwc, ((0, 0), (1, 1), (1, 1), (0, 0))).astype(compute_dtype)
    Hp, Wp = H + 2, W + 2
    Hps, Wps = _round_up(Hp, stride), _round_up(Wp, stride)
    if (Hps, Wps) != (Hp, Wp):
        xp = jnp.pad(xp, ((0, 0), (0, Hps - Hp), (0, Wps - Wp), (0, 0)))
    Hh, Wh = Hps // stride, Wps // stride
    xph = xp.reshape(N, Hh, stride, Wh, stride, C).transpose(0, 2, 4, 1, 3, 5)
    return xph                                   # (N, stride, stride, Hh, Wh, C)


def _pad_vec(v, n):
    v = v.reshape(-1).astype(jnp.float32)
    if v.shape[0] < n:
        v = jnp.pad(v, (0, n - v.shape[0]))
    return v[None, :]                            # (1, n)


def _bn_scale_bias(mean_i, m2_i, count, gamma, beta, cp):
    # Chan combination of per-image (count, mean, M2) Welford partials.
    # mean_i, m2_i: (N, 1, Cp); every image contributes `count` rows.
    n_img = mean_i.shape[0]
    mean = jnp.mean(mean_i, axis=0)                                  # (1, Cp)
    m2 = jnp.sum(m2_i, axis=0) + count * jnp.sum(
        jnp.square(mean_i - mean), axis=0)
    var = m2 / (n_img * count)                                       # biased var
    g = _pad_vec(gamma, cp)
    b = _pad_vec(beta, cp)
    scale = g * jax.lax.rsqrt(var + BN_EPS)
    bias = b - mean * scale
    return scale, bias                                               # (1, Cp) each


def init_basic_block(key, in_channels, out_channels, stride):
    ks = jax.random.split(key, 10)
    p = {
        "stride": stride,
        "w1": 0.1 * jax.random.normal(ks[0], (3, 3, in_channels, out_channels), jnp.float32),
        "g1": 1.0 + 0.1 * jax.random.normal(ks[1], (1, out_channels), jnp.float32),
        "b1": 0.1 * jax.random.normal(ks[2], (1, out_channels), jnp.float32),
        "w2": 0.1 * jax.random.normal(ks[3], (3, 3, out_channels, out_channels), jnp.float32),
        "g2": 1.0 + 0.1 * jax.random.normal(ks[4], (1, out_channels), jnp.float32),
        "b2": 0.1 * jax.random.normal(ks[5], (1, out_channels), jnp.float32),
    }
    if stride != 1 or in_channels != out_channels:
        p["ws"] = 0.1 * jax.random.normal(ks[6], (1, 1, in_channels, out_channels), jnp.float32)
        p["gs"] = 1.0 + 0.1 * jax.random.normal(ks[7], (1, out_channels), jnp.float32)
        p["bs"] = 0.1 * jax.random.normal(ks[8], (1, out_channels), jnp.float32)
    return p


def basic_block_forward(params, x_nchw, *, compute_dtype=jnp.bfloat16):
    x = jnp.transpose(x_nchw, (0, 2, 3, 1)).astype(jnp.float32)     # NHWC
    N, H, W, Cin = x.shape
    stride = params["stride"]
    Cout = params["w1"].shape[-1]
    Cp = _round_up(Cout, LANE)
    Ho = (H + 2 - 3) // stride + 1
    Wo = (W + 2 - 3) // stride + 1
    M = Ho * Wo

    # TODO(synk): for very large feature maps (H*W beyond a few thousand rows)
    # the per-image block should additionally be split into row tiles with a
    # 2-row halo to bound VMEM; not needed for standard ResNet block shapes.
    xph = _phase_decompose(x, stride, compute_dtype)

    w1p = jnp.pad(params["w1"].reshape(9, Cin, Cout),
                  ((0, 0), (0, 0), (0, Cp - Cout))).astype(compute_dtype)
    w2p = jnp.pad(params["w2"].reshape(9, Cout, Cout),
                  ((0, 0), (0, Cp - Cout), (0, Cp - Cout))).astype(compute_dtype)
    if "ws" in params:
        ws = params["ws"].reshape(Cin, Cout)
    else:
        ws = jnp.eye(Cin, Cout, dtype=jnp.float32)   # identity shortcut as 1x1 eye
    wsp = jnp.pad(ws, ((0, 0), (0, Cp - Cout))).astype(compute_dtype)

    # Pass 1: conv1 taps (+ BN1 partials, + shortcut 1x1 stats), y1 in bf16.
    y1, m1, v1, msc, vsc = _conv1_call(xph, w1p, wsp, stride=stride, Ho=Ho, Wo=Wo)
    s1, b1 = _bn_scale_bias(m1, v1, M, params["g1"], params["b1"], Cp)

    # Pass 2: BN1-apply + ReLU fused into conv2's input read, conv2 taps,
    # BN2 partials, y2 in bf16.
    y2, m2, v2 = _conv2_call(y1, s1, b1, w2p)
    s2, b2 = _bn_scale_bias(m2, v2, M, params["g2"], params["b2"], Cp)

    if "ws" in params:
        ss, bs = _bn_scale_bias(msc, vsc, M, params["gs"], params["bs"], Cp)
    else:
        ss = jnp.ones((1, Cp), jnp.float32)
        bs = jnp.zeros((1, Cp), jnp.float32)

    # Pass 3: BN2-apply + shortcut recompute + shortcut-BN + add + final ReLU.
    out = _final_call(y2, xph, wsp, s2, b2, ss, bs, stride=stride, Ho=Ho, Wo=Wo)
    out = out[:, :, :Cout].reshape(N, Ho, Wo, Cout)
    # TODO(synk): BatchNorm running_mean/running_var buffer updates (module
    # training state) are not modeled; normalization matches PyTorch
    # training-mode forward.
    return jnp.transpose(out, (0, 3, 1, 2))                         # NCHW


# ------------------------------ pure-JAX reference ---------------------------

def _conv_ref(x, w, stride, pad, dtype):
    return jax.lax.conv_general_dilated(
        x.astype(dtype), w.astype(dtype), (stride, stride),
        [(pad, pad), (pad, pad)],
        dimension_numbers=("NHWC", "HWIO", "NHWC"),
        preferred_element_type=jnp.float32)


def _bn_ref(y, gamma, beta):
    mean = jnp.mean(y, axis=(0, 1, 2), keepdims=True)
    var = jnp.mean(jnp.square(y - mean), axis=(0, 1, 2), keepdims=True)
    return ((y - mean) * jax.lax.rsqrt(var + BN_EPS)
            * gamma.reshape(1, 1, 1, -1) + beta.reshape(1, 1, 1, -1))


def basic_block_ref(params, x_nchw, conv_dtype=jnp.float32):
    # conv_dtype=bf16 gives a reference consistent with the kernel's bf16 MXU
    # operands; conv_dtype=f32 matches the PyTorch f32 module.
    x = jnp.transpose(x_nchw, (0, 2, 3, 1)).astype(jnp.float32)
    s = params["stride"]
    out = jnp.maximum(_bn_ref(_conv_ref(x, params["w1"], s, 1, conv_dtype),
                              params["g1"], params["b1"]), 0.0)
    out = _bn_ref(_conv_ref(out, params["w2"], 1, 1, conv_dtype),
                  params["g2"], params["b2"])
    if "ws" in params:
        sc = _bn_ref(_conv_ref(x, params["ws"], s, 0, conv_dtype),
                     params["gs"], params["bs"])
    else:
        sc = x
    out = jnp.maximum(out + sc, 0.0)
    return jnp.transpose(out, (0, 3, 1, 2))


# ----------------------------------- main ------------------------------------

if __name__ == "__main__":
    key = jax.random.PRNGKey(0)
    kx, kp1, kp2 = jax.random.split(key, 3)

    x = jax.random.normal(kx, (2, 4, 16, 16), jnp.float32)           # NCHW

    # Case 1: downsampling block with 1x1-conv shortcut (4 -> 8, stride=2).
    params_a = init_basic_block(kp1, 4, 8, stride=2)
    out_a = jax.block_until_ready(basic_block_forward(params_a, x))
    assert out_a.shape == (2, 8, 8, 8)
    # Tolerances reflect bf16 MXU operands + bf16 intermediates (review item 2).
    ref_a_bf16 = basic_block_ref(params_a, x, conv_dtype=jnp.bfloat16)
    np.testing.assert_allclose(np.asarray(out_a), np.asarray(ref_a_bf16),
                               rtol=6e-2, atol=6e-2)
    ref_a_f32 = basic_block_ref(params_a, x, conv_dtype=jnp.float32)
    np.testing.assert_allclose(np.asarray(out_a), np.asarray(ref_a_f32),
                               rtol=1e-1, atol=1e-1)

    # Case 2: identity-shortcut block (4 -> 4, stride=1).
    params_b = init_basic_block(kp2, 4, 4, stride=1)
    out_b = jax.block_until_ready(basic_block_forward(params_b, x))
    assert out_b.shape == (2, 4, 16, 16)
    ref_b_bf16 = basic_block_ref(params_b, x, conv_dtype=jnp.bfloat16)
    np.testing.assert_allclose(np.asarray(out_b), np.asarray(ref_b_bf16),
                               rtol=6e-2, atol=6e-2)
    ref_b_f32 = basic_block_ref(params_b, x, conv_dtype=jnp.float32)
    np.testing.assert_allclose(np.asarray(out_b), np.asarray(ref_b_f32),
                               rtol=1e-1, atol=1e-1)

    print("KERNEL_OK")
</pallas_src>

<mosaic_0001>
module attributes {stable_mosaic.version = 11 : i64} {
  func.func @_copy(%arg0: i32, %arg1: memref<8x128xf32, #tpu.memory_space<vmem>>, %arg2: memref<8x128xf32, #tpu.memory_space<vmem>>) attributes {dimension_semantics = [#tpu.dimension_semantics<parallel>], iteration_bounds = array<i64: 1>, scalar_prefetch = 0 : i64, scratch_operands = 0 : i64, tpu.core_type = #tpu.core_type<tc>, window_params = [{pipeline_mode = #tpu.pipeline_mode<synchronous>, transform_indices = @transform_0, window_bounds = array<i64: 8, 128>}, {pipeline_mode = #tpu.pipeline_mode<synchronous>, transform_indices = @transform_1, window_bounds = array<i64: 8, 128>}]} {
    %c0 = arith.constant 0 : index
    %c0_0 = arith.constant 0 : index
    %0 = vector.load %arg1[%c0, %c0_0] : memref<8x128xf32, #tpu.memory_space<vmem>>, vector<8x128xf32>
    %c0_1 = arith.constant 0 : index
    %c0_2 = arith.constant 0 : index
    %1 = vector.load %arg2[%c0_1, %c0_2] : memref<8x128xf32, #tpu.memory_space<vmem>>, vector<8x128xf32>
    tpu.vector_store %arg2[%c0_1, %c0_2], %0 {strides = array<i32>} : memref<8x128xf32, #tpu.memory_space<vmem>>, vector<8x128xf32>,
    return
  }
  func.func @transform_0(%arg0: i32) -> (i32, i32) {
    %c0_i32 = arith.constant 0 : i32
    %c0_i32_0 = arith.constant 0 : i32
    %c0_i32_1 = arith.constant 0 : i32
    return %c0_i32, %c0_i32_0 : i32, i32
  }
  func.func @transform_1(%arg0: i32) -> (i32, i32) {
    %c0_i32 = arith.constant 0 : i32
    %c0_i32_0 = arith.constant 0 : i32
    %c0_i32_1 = arith.constant 0 : i32
    return %c0_i32, %c0_i32_0 : i32, i32
  }
}

module attributes {stable_mosaic.version = 11 : i64} {
  func.func @kernel(%arg0: i32, %arg1: memref<1x2x2x9x9x4xbf16, #tpu.memory_space<vmem>>, %arg2: memref<9x4x128xbf16, #tpu.memory_space<vmem>>, %arg3: memref<4x128xbf16, #tpu.memory_space<vmem>>, %arg4: memref<1x8x8x128xbf16, #tpu.memory_space<vmem>>, %arg5: memref<1x1x128xf32, #tpu.memory_space<vmem>>, %arg6: memref<1x1x128xf32, #tpu.memory_space<vmem>>, %arg7: memref<1x1x128xf32, #tpu.memory_space<vmem>>, %arg8: memref<1x1x128xf32, #tpu.memory_space<vmem>>) attributes {dimension_semantics = [#tpu.dimension_semantics<parallel>], iteration_bounds = array<i64: 2>, scalar_prefetch = 0 : i64, scratch_operands = 0 : i64, tpu.core_type = #tpu.core_type<tc>, window_params = [{transform_indices = @transform_0, window_bounds = array<i64: 1, 2, 2, 9, 9, 4>}, {pipeline_mode = #tpu.pipeline_mode<synchronous>, transform_indices = @transform_1, window_bounds = array<i64: 9, 4, 128>}, {pipeline_mode = #tpu.pipeline_mode<synchronous>, transform_indices = @transform_2, window_bounds = array<i64: 4, 128>}, {transform_indices = @transform_3, window_bounds = array<i64: 1, 8, 8, 128>}, {transform_indices = @transform_4, window_bounds = array<i64: 1, 1, 128>}, {transform_indices = @transform_5, window_bounds = array<i64: 1, 1, 128>}, {transform_indices = @transform_6, window_bounds = array<i64: 1, 1, 128>}, {transform_indices = @transform_7, window_bounds = array<i64: 1, 1, 128>}]} {
    %cst = arith.constant 0.000000e+00 : f32
    %0 = vector.broadcast %cst : f32 to vector<64x128xf32>
    %c0 = arith.constant 0 : index
    %c0_0 = arith.constant 0 : index
    %c0_1 = arith.constant 0 : index
    %c0_2 = arith.constant 0 : index
    %c0_3 = arith.constant 0 : index
    %c0_4 = arith.constant 0 : index
    %1 = vector.load %arg1[%c0, %c0_0, %c0_1, %c0_2, %c0_3, %c0_4] : memref<1x2x2x9x9x4xbf16, #tpu.memory_space<vmem>>, vector<1x1x1x8x8x4xbf16>
    %2 = vector.shape_cast %1 : vector<1x1x1x8x8x4xbf16> to vector<8x8x4xbf16>
    %3 = vector.shape_cast %2 : vector<8x8x4xbf16> to vector<64x4xbf16>
    %c0_5 = arith.constant 0 : index
    %c0_6 = arith.constant 0 : index
    %c0_7 = arith.constant 0 : index
    %4 = vector.load %arg2[%c0_5, %c0_6, %c0_7] : memref<9x4x128xbf16, #tpu.memory_space<vmem>>, vector<1x4x128xbf16>
    %5 = vector.shape_cast %4 : vector<1x4x128xbf16> to vector<4x128xbf16>
    %cst_8 = arith.constant dense<0.000000e+00> : vector<64x128xf32>
    %6 = tpu.matmul %3, %5, %cst_8 {dimension_numbers = #tpu.dot_dimension_numbers<[1], [0], [0], [1], [0, 0, 1, 1], [], []>} : vector<64x4xbf16>, vector<4x128xbf16>, vector<64x128xf32> -> vector<64x128xf32>
    %7 = arith.addf %0, %6 : vector<64x128xf32>
    %c0_9 = arith.constant 0 : index
    %c0_10 = arith.constant 0 : index
    %c1 = arith.constant 1 : index
    %c0_11 = arith.constant 0 : index
    %c0_12 = arith.constant 0 : index
    %c0_13 = arith.constant 0 : index
    %8 = vector.load %arg1[%c0_9, %c0_10, %c1, %c0_11, %c0_12, %c0_13] : memref<1x2x2x9x9x4xbf16, #tpu.memory_space<vmem>>, vector<1x1x1x8x8x4xbf16>
    %9 = vector.shape_cast %8 : vector<1x1x1x8x8x4xbf16> to vector<8x8x4xbf16>
    %10 = vector.shape_cast %9 : vector<8x8x4xbf16> to vector<64x4xbf16>
    %c1_14 = arith.constant 1 : index
    %c0_15 = arith.constant 0 : index
    %c0_16 = arith.constant 0 : index
    %11 = vector.load %arg2[%c1_14, %c0_15, %c0_16] : memref<9x4x128xbf16, #tpu.memory_space<vmem>>, vector<1x4x128xbf16>
    %12 = vector.shape_cast %11 : vector<1x4x128xbf16> to vector<4x128xbf16>
    %cst_17 = arith.constant dense<0.000000e+00> : vector<64x128xf32>
    %13 = tpu.matmul %10, %12, %cst_17 {dimension_numbers = #tpu.dot_dimension_numbers<[1], [0], [0], [1], [0, 0, 1, 1], [], []>} : vector<64x4xbf16>, vector<4x128xbf16>, vector<64x128xf32> -> vector<64x128xf32>
    %14 = arith.addf %7, %13 : vector<64x128xf32>
    %c0_18 = arith.constant 0 : index
    %c0_19 = arith.constant 0 : index
    %c0_20 = arith.constant 0 : index
    %c0_21 = arith.constant 0 : index
    %c1_22 = arith.constant 1 : index
    %c0_23 = arith.constant 0 : index
    %15 = vector.load %arg1[%c0_18, %c0_19, %c0_20, %c0_21, %c1_22, %c0_23] : memref<1x2x2x9x9x4xbf16, #tpu.memory_space<vmem>>, vector<1x1x1x8x8x4xbf16>
    %16 = vector.shape_cast %15 : vector<1x1x1x8x8x4xbf16> to vector<8x8x4xbf16>
    %17 = vector.shape_cast %16 : vector<8x8x4xbf16> to vector<64x4xbf16>
    %c2 = arith.constant 2 : index
    %c0_24 = arith.constant 0 : index
    %c0_25 = arith.constant 0 : index
    %18 = vector.load %arg2[%c2, %c0_24, %c0_25] : memref<9x4x128xbf16, #tpu.memory_space<vmem>>, vector<1x4x128xbf16>
    %19 = vector.shape_cast %18 : vector<1x4x128xbf16> to vector<4x128xbf16>
    %cst_26 = arith.constant dense<0.000000e+00> : vector<64x128xf32>
    %20 = tpu.matmul %17, %19, %cst_26 {dimension_numbers = #tpu.dot_dimension_numbers<[1], [0], [0], [1], [0, 0, 1, 1], [], []>} : vector<64x4xbf16>, vector<4x128xbf16>, vector<64x128xf32> -> vector<64x128xf32>
    %21 = arith.addf %14, %20 : vector<64x128xf32>
    %c0_27 = arith.constant 0 : index
    %c1_28 = arith.constant 1 : index
    %c0_29 = arith.constant 0 : index
    %c0_30 = arith.constant 0 : index
    %c0_31 = arith.constant 0 : index
    %c0_32 = arith.constant 0 : index
    %22 = vector.load %arg1[%c0_27, %c1_28, %c0_29, %c0_30, %c0_31, %c0_32] : memref<1x2x2x9x9x4xbf16, #tpu.memory_space<vmem>>, vector<1x1x1x8x8x4xbf16>
    %23 = vector.shape_cast %22 : vector<1x1x1x8x8x4xbf16> to vector<8x8x4xbf16>
    %24 = vector.shape_cast %23 : vector<8x8x4xbf16> to vector<64x4xbf16>
    %c3 = arith.constant 3 : index
    %c0_33 = arith.constant 0 : index
    %c0_34 = arith.constant 0 : index
    %25 = vector.load %arg2[%c3, %c0_33, %c0_34] : memref<9x4x128xbf16, #tpu.memory_space<vmem>>, vector<1x4x128xbf16>
    %26 = vector.shape_cast %25 : vector<1x4x128xbf16> to vector<4x128xbf16>
    %cst_35 = arith.constant dense<0.000000e+00> : vector<64x128xf32>
    %27 = tpu.matmul %24, %26, %cst_35 {dimension_numbers = #tpu.dot_dimension_numbers<[1], [0], [0], [1], [0, 0, 1, 1], [], []>} : vector<64x4xbf16>, vector<4x128xbf16>, vector<64x128xf32> -> vector<64x128xf32>
    %28 = arith.addf %21, %27 : vector<64x128xf32>
    %c0_36 = arith.constant 0 : index
    %c1_37 = arith.constant 1 : index
    %c1_38 = arith.constant 1 : index
    %c0_39 = arith.constant 0 : index
    %c0_40 = arith.constant 0 : index
    %c0_41 = arith.constant 0 : index
    %29 = vector.load %arg1[%c0_36, %c1_37, %c1_38, %c0_39, %c0_40, %c0_41] : memref<1x2x2x9x9x4xbf16, #tpu.memory_space<vmem>>, vector<1x1x1x8x8x4xbf16>
    %30 = vector.shape_cast %29 : vector<1x1x1x8x8x4xbf16> to vector<8x8x4xbf16>
    %31 = vector.shape_cast %30 : vector<8x8x4xbf16> to vector<64x4xbf16>
    %c4 = arith.constant 4 : index
    %c0_42 = arith.constant 0 : index
    %c0_43 = arith.constant 0 : index
    %32 = vector.load %arg2[%c4, %c0_42, %c0_43] : memref<9x4x128xbf16, #tpu.memory_space<vmem>>, vector<1x4x128xbf16>
    %33 = vector.shape_cast %32 : vector<1x4x128xbf16> to vector<4x128xbf16>
    %cst_44 = arith.constant dense<0.000000e+00> : vector<64x128xf32>
    %34 = tpu.matmul %31, %33, %cst_44 {dimension_numbers = #tpu.dot_dimension_numbers<[1], [0], [0], [1], [0, 0, 1, 1], [], []>} : vector<64x4xbf16>, vector<4x128xbf16>, vector<64x128xf32> -> vector<64x128xf32>
    %35 = arith.addf %28, %34 : vector<64x128xf32>
    %c0_45 = arith.constant 0 : index
    %c1_46 = arith.constant 1 : index
    %c0_47 = arith.constant 0 : index
    %c0_48 = arith.constant 0 : index
    %c1_49 = arith.constant 1 : index
    %c0_50 = arith.constant 0 : index
    %36 = vector.load %arg1[%c0_45, %c1_46, %c0_47, %c0_48, %c1_49, %c0_50] : memref<1x2x2x9x9x4xbf16, #tpu.memory_space<vmem>>, vector<1x1x1x8x8x4xbf16>
    %37 = vector.shape_cast %36 : vector<1x1x1x8x8x4xbf16> to vector<8x8x4xbf16>
    %38 = vector.shape_cast %37 : vector<8x8x4xbf16> to vector<64x4xbf16>
    %c5 = arith.constant 5 : index
    %c0_51 = arith.constant 0 : index
    %c0_52 = arith.constant 0 : index
    %39 = vector.load %arg2[%c5, %c0_51, %c0_52] : memref<9x4x128xbf16, #tpu.memory_space<vmem>>, vector<1x4x128xbf16>
    %40 = vector.shape_cast %39 : vector<1x4x128xbf16> to vector<4x128xbf16>
    %cst_53 = arith.constant dense<0.000000e+00> : vector<64x128xf32>
    %41 = tpu.matmul %38, %40, %cst_53 {dimension_numbers = #tpu.dot_dimension_numbers<[1], [0], [0], [1], [0, 0, 1, 1], [], []>} : vector<64x4xbf16>, vector<4x128xbf16>, vector<64x128xf32> -> vector<64x128xf32>
    %42 = arith.addf %35, %41 : vector<64x128xf32>
    %c0_54 = arith.constant 0 : index
    %c0_55 = arith.constant 0 : index
    %c0_56 = arith.constant 0 : index
    %c1_57 = arith.constant 1 : index
    %c0_58 = arith.constant 0 : index
    %c0_59 = arith.constant 0 : index
    %43 = vector.load %arg1[%c0_54, %c0_55, %c0_56, %c1_57, %c0_58, %c0_59] : memref<1x2x2x9x9x4xbf16, #tpu.memory_space<vmem>>, vector<1x1x1x8x8x4xbf16>
    %44 = vector.shape_cast %43 : vector<1x1x1x8x8x4xbf16> to vector<8x8x4xbf16>
    %45 = vector.shape_cast %44 : vector<8x8x4xbf16> to vector<64x4xbf16>
    %c6 = arith.constant 6 : index
    %c0_60 = arith.constant 0 : index
    %c0_61 = arith.constant 0 : index
    %46 = vector.load %arg2[%c6, %c0_60, %c0_61] : memref<9x4x128xbf16, #tpu.memory_space<vmem>>, vector<1x4x128xbf16>
    %47 = vector.shape_cast %46 : vector<1x4x128xbf16> to vector<4x128xbf16>
    %cst_62 = arith.constant dense<0.000000e+00> : vector<64x128xf32>
    %48 = tpu.matmul %45, %47, %cst_62 {dimension_numbers = #tpu.dot_dimension_numbers<[1], [0], [0], [1], [0, 0, 1, 1], [], []>} : vector<64x4xbf16>, vector<4x128xbf16>, vector<64x128xf32> -> vector<64x128xf32>
    %49 = arith.addf %42, %48 : vector<64x128xf32>
    %c0_63 = arith.constant 0 : index
    %c0_64 = arith.constant 0 : index
    %c1_65 = arith.constant 1 : index
    %c1_66 = arith.constant 1 : index
    %c0_67 = arith.constant 0 : index
    %c0_68 = arith.constant 0 : index
    %50 = vector.load %arg1[%c0_63, %c0_64, %c1_65, %c1_66, %c0_67, %c0_68] : memref<1x2x2x9x9x4xbf16, #tpu.memory_space<vmem>>, vector<1x1x1x8x8x4xbf16>
    %51 = vector.shape_cast %50 : vector<1x1x1x8x8x4xbf16> to vector<8x8x4xbf16>
    %52 = vector.shape_cast %51 : vector<8x8x4xbf16> to vector<64x4xbf16>
    %c7 = arith.constant 7 : index
    %c0_69 = arith.constant 0 : index
    %c0_70 = arith.constant 0 : index
    %53 = vector.load %arg2[%c7, %c0_69, %c0_70] : memref<9x4x128xbf16, #tpu.memory_space<vmem>>, vector<1x4x128xbf16>
    %54 = vector.shape_cast %53 : vector<1x4x128xbf16> to vector<4x128xbf16>
    %cst_71 = arith.constant dense<0.000000e+00> : vector<64x128xf32>
    %55 = tpu.matmul %52, %54, %cst_71 {dimension_numbers = #tpu.dot_dimension_numbers<[1], [0], [0], [1], [0, 0, 1, 1], [], []>} : vector<64x4xbf16>, vector<4x128xbf16>, vector<64x128xf32> -> vector<64x128xf32>
    %56 = arith.addf %49, %55 : vector<64x128xf32>
    %c0_72 = arith.constant 0 : index
    %c0_73 = arith.constant 0 : index
    %c0_74 = arith.constant 0 : index
    %c1_75 = arith.constant 1 : index
    %c1_76 = arith.constant 1 : index
    %c0_77 = arith.constant 0 : index
    %57 = vector.load %arg1[%c0_72, %c0_73, %c0_74, %c1_75, %c1_76, %c0_77] : memref<1x2x2x9x9x4xbf16, #tpu.memory_space<vmem>>, vector<1x1x1x8x8x4xbf16>
    %58 = vector.shape_cast %57 : vector<1x1x1x8x8x4xbf16> to vector<8x8x4xbf16>
    %59 = vector.shape_cast %58 : vector<8x8x4xbf16> to vector<64x4xbf16>
    %c8 = arith.constant 8 : index
    %c0_78 = arith.constant 0 : index
    %c0_79 = arith.constant 0 : index
    %60 = vector.load %arg2[%c8, %c0_78, %c0_79] : memref<9x4x128xbf16, #tpu.memory_space<vmem>>, vector<1x4x128xbf16>
    %61 = vector.shape_cast %60 : vector<1x4x128xbf16> to vector<4x128xbf16>
    %cst_80 = arith.constant dense<0.000000e+00> : vector<64x128xf32>
    %62 = tpu.matmul %59, %61, %cst_80 {dimension_numbers = #tpu.dot_dimension_numbers<[1], [0], [0], [1], [0, 0, 1, 1], [], []>} : vector<64x4xbf16>, vector<4x128xbf16>, vector<64x128xf32> -> vector<64x128xf32>
    %63 = arith.addf %56, %62 : vector<64x128xf32>
    %cst_81 = arith.constant dense<0.000000e+00> : vector<128xf32>
    %64 = vector.multi_reduction <add>, %63, %cst_81 [0] : vector<64x128xf32> to vector<128xf32>
    %65 = vector.shape_cast %64 : vector<128xf32> to vector<1x128xf32>
    %cst_82 = arith.constant 1.562500e-02 : f32
    %66 = vector.broadcast %cst_82 : f32 to vector<1x128xf32>
    %67 = arith.mulf %65, %66 : vector<1x128xf32>
    %68 = vector.broadcast %67 : vector<1x128xf32> to vector<64x128xf32>
    %69 = arith.subf %63, %68 : vector<64x128xf32>
    %c0_83 = arith.constant 0 : index
    %c0_84 = arith.constant 0 : index
    %c0_85 = arith.constant 0 : index
    %70 = vector.load %arg5[%c0_83, %c0_84, %c0_85] : memref<1x1x128xf32, #tpu.memory_space<vmem>>, vector<1x1x128xf32>
    %71 = vector.shape_cast %70 : vector<1x1x128xf32> to vector<1x128xf32>
    %72 = vector.shape_cast %67 : vector<1x128xf32> to vector<1x1x128xf32>
    tpu.vector_store %arg5[%c0_83, %c0_84, %c0_85], %72 {strides = array<i32>} : memref<1x1x128xf32, #tpu.memory_space<vmem>>, vector<1x1x128xf32>,
    %73 = arith.mulf %69, %69 : vector<64x128xf32>
    %cst_86 = arith.constant dense<0.000000e+00> : vector<128xf32>
    %74 = vector.multi_reduction <add>, %73, %cst_86 [0] : vector<64x128xf32> to vector<128xf32>
    %75 = vector.shape_cast %74 : vector<128xf32> to vector<1x128xf32>
    %c0_87 = arith.constant 0 : index
    %c0_88 = arith.constant 0 : index
    %c0_89 = arith.constant 0 : index
    %76 = vector.load %arg6[%c0_87, %c0_88, %c0_89] : memref<1x1x128xf32, #tpu.memory_space<vmem>>, vector<1x1x128xf32>
    %77 = vector.shape_cast %76 : vector<1x1x128xf32> to vector<1x128xf32>
    %78 = vector.shape_cast %75 : vector<1x128xf32> to vector<1x1x128xf32>
    tpu.vector_store %arg6[%c0_87, %c0_88, %c0_89], %78 {strides = array<i32>} : memref<1x1x128xf32, #tpu.memory_space<vmem>>, vector<1x1x128xf32>,
    %c0_90 = arith.constant 0 : index
    %c1_91 = arith.constant 1 : index
    %c1_92 = arith.constant 1 : index
    %c0_93 = arith.constant 0 : index
    %c0_94 = arith.constant 0 : index
    %c0_95 = arith.constant 0 : index
    %79 = vector.load %arg1[%c0_90, %c1_91, %c1_92, %c0_93, %c0_94, %c0_95] : memref<1x2x2x9x9x4xbf16, #tpu.memory_space<vmem>>, vector<1x1x1x8x8x4xbf16>
    %80 = vector.shape_cast %79 : vector<1x1x1x8x8x4xbf16> to vector<8x8x4xbf16>
    %81 = vector.shape_cast %80 : vector<8x8x4xbf16> to vector<64x4xbf16>
    %c0_96 = arith.constant 0 : index
    %c0_97 = arith.constant 0 : index
    %82 = vector.load %arg3[%c0_96, %c0_97] : memref<4x128xbf16, #tpu.memory_space<vmem>>, vector<4x128xbf16>
    %cst_98 = arith.constant dense<0.000000e+00> : vector<64x128xf32>
    %83 = tpu.matmul %81, %82, %cst_98 {dimension_numbers = #tpu.dot_dimension_numbers<[1], [0], [0], [1], [0, 0, 1, 1], [], []>} : vector<64x4xbf16>, vector<4x128xbf16>, vector<64x128xf32> -> vector<64x128xf32>
    %cst_99 = arith.constant dense<0.000000e+00> : vector<128xf32>
    %84 = vector.multi_reduction <add>, %83, %cst_99 [0] : vector<64x128xf32> to vector<128xf32>
    %85 = vector.shape_cast %84 : vector<128xf32> to vector<1x128xf32>
    %cst_100 = arith.constant 1.562500e-02 : f32
    %86 = vector.broadcast %cst_100 : f32 to vector<1x128xf32>
    %87 = arith.mulf %85, %86 : vector<1x128xf32>
    %88 = vector.broadcast %87 : vector<1x128xf32> to vector<64x128xf32>
    %89 = arith.subf %83, %88 : vector<64x128xf32>
    %c0_101 = arith.constant 0 : index
    %c0_102 = arith.constant 0 : index
    %c0_103 = arith.constant 0 : index
    %90 = vector.load %arg7[%c0_101, %c0_102, %c0_103] : memref<1x1x128xf32, #tpu.memory_space<vmem>>, vector<1x1x128xf32>
    %91 = vector.shape_cast %90 : vector<1x1x128xf32> to vector<1x128xf32>
    %92 = vector.shape_cast %87 : vector<1x128xf32> to vector<1x1x128xf32>
    tpu.vector_store %arg7[%c0_101, %c0_102, %c0_103], %92 {strides = array<i32>} : memref<1x1x128xf32, #tpu.memory_space<vmem>>, vector<1x1x128xf32>,
    %93 = arith.mulf %89, %89 : vector<64x128xf32>
    %cst_104 = arith.constant dense<0.000000e+00> : vector<128xf32>
    %94 = vector.multi_reduction <add>, %93, %cst_104 [0] : vector<64x128xf32> to vector<128xf32>
    %95 = vector.shape_cast %94 : vector<128xf32> to vector<1x128xf32>
    %c0_105 = arith.constant 0 : index
    %c0_106 = arith.constant 0 : index
    %c0_107 = arith.constant 0 : index
    %96 = vector.load %arg8[%c0_105, %c0_106, %c0_107] : memref<1x1x128xf32, #tpu.memory_space<vmem>>, vector<1x1x128xf32>
    %97 = vector.shape_cast %96 : vector<1x1x128xf32> to vector<1x128xf32>
    %98 = vector.shape_cast %95 : vector<1x128xf32> to vector<1x1x128xf32>
    tpu.vector_store %arg8[%c0_105, %c0_106, %c0_107], %98 {strides = array<i32>} : memref<1x1x128xf32, #tpu.memory_space<vmem>>, vector<1x1x128xf32>,
    %99 = vector.shape_cast %63 : vector<64x128xf32> to vector<8x8x128xf32>
    %100 = arith.truncf %99 : vector<8x8x128xf32> to vector<8x8x128xbf16>
    %c0_108 = arith.constant 0 : index
    %c0_109 = arith.constant 0 : index
    %c0_110 = arith.constant 0 : index
    %c0_111 = arith.constant 0 : index
    %101 = vector.load %arg4[%c0_108, %c0_109, %c0_110, %c0_111] : memref<1x8x8x128xbf16, #tpu.memory_space<vmem>>, vector<1x8x8x128xbf16>
    %102 = vector.shape_cast %101 : vector<1x8x8x128xbf16> to vector<8x8x128xbf16>
    %103 = vector.shape_cast %100 : vector<8x8x128xbf16> to vector<1x8x8x128xbf16>
    tpu.vector_store %arg4[%c0_108, %c0_109, %c0_110, %c0_111], %103 {strides = array<i32>} : memref<1x8x8x128xbf16, #tpu.memory_space<vmem>>, vector<1x8x8x128xbf16>,
    return
  }
  func.func @transform_0(%arg0: i32) -> (i32, i32, i32, i32, i32, i32) {
    %c0_i32 = arith.constant 0 : i32
    %c0_i32_0 = arith.constant 0 : i32
    %c0_i32_1 = arith.constant 0 : i32
    %c0_i32_2 = arith.constant 0 : i32
    %c0_i32_3 = arith.constant 0 : i32
    %c0_i32_4 = arith.constant 0 : i32
    return %arg0, %c0_i32, %c0_i32_0, %c0_i32_1, %c0_i32_2, %c0_i32_3 : i32, i32, i32, i32, i32, i32
  }
  func.func @transform_1(%arg0: i32) -> (i32, i32, i32) {
    %c0_i32 = arith.constant 0 : i32
    %c0_i32_0 = arith.constant 0 : i32
    %c0_i32_1 = arith.constant 0 : i32
    %c0_i32_2 = arith.constant 0 : i32
    return %c0_i32, %c0_i32_0, %c0_i32_1 : i32, i32, i32
  }
  func.func @transform_2(%arg0: i32) -> (i32, i32) {
    %c0_i32 = arith.constant 0 : i32
    %c0_i32_0 = arith.constant 0 : i32
    %c0_i32_1 = arith.constant 0 : i32
    return %c0_i32, %c0_i32_0 : i32, i32
  }
  func.func @transform_3(%arg0: i32) -> (i32, i32, i32, i32) {
    %c0_i32 = arith.constant 0 : i32
    %c0_i32_0 = arith.constant 0 : i32
    %c0_i32_1 = arith.constant 0 : i32
    %c0_i32_2 = arith.constant 0 : i32
    return %arg0, %c0_i32, %c0_i32_0, %c0_i32_1 : i32, i32, i32, i32
  }
  func.func @transform_4(%arg0: i32) -> (i32, i32, i32) {
    %c0_i32 = arith.constant 0 : i32
    %c0_i32_0 = arith.constant 0 : i32
    %c0_i32_1 = arith.constant 0 : i32
    return %arg0, %c0_i32, %c0_i32_0 : i32, i32, i32
  }
  func.func @transform_5(%arg0: i32) -> (i32, i32, i32) {
    %c0_i32 = arith.constant 0 : i32
    %c0_i32_0 = arith.constant 0 : i32
    %c0_i32_1 = arith.constant 0 : i32
    return %arg0, %c0_i32, %c0_i32_0 : i32, i32, i32
  }
  func.func @transform_6(%arg0: i32) -> (i32, i32, i32) {
    %c0_i32 = arith.constant 0 : i32
    %c0_i32_0 = arith.constant 0 : i32
    %c0_i32_1 = arith.constant 0 : i32
    return %arg0, %c0_i32, %c0_i32_0 : i32, i32, i32
  }
  func.func @transform_7(%arg0: i32) -> (i32, i32, i32) {
    %c0_i32 = arith.constant 0 : i32
    %c0_i32_0 = arith.constant 0 : i32
    %c0_i32_1 = arith.constant 0 : i32
    return %arg0, %c0_i32, %c0_i32_0 : i32, i32, i32
  }
}

</mosaic_0001>

<bundles_post_ra>
// kernel: tpu_custom_call.1
= control target key start
LH: loop header
LB: loop body
LE: loop exit
PB: predicated region body
PF: predicated region fallthrough
CT: control target
= control target key end

     0   :  { %6 = vsyncpa [#allocation3], 0  ;;  %s124_s0 = inlined_call_operand.hbm [shape: f32[8,128], index: 0, kind: input, shape index: {}]   ;;  %s125_s1 = inlined_call_operand.hbm [shape: f32[8,128], index: 1, kind: output, shape index: {}]  }
   0x1   :  { %7 = vsyncpa [#allocation4], 0  ;;  %s88_s6 = smov [#allocation2]   ;;  %s40_s10 = scalar_lea.hbm %s124_s0, 128 }
   0x2   :  { %s14_s7 = sshll.u32 %s88_s6, 4  ;;  %p41_p0 = scmp.ne.s32.totalorder %s124_s0, %s40_s10  ;;  %s15_s7 = int_to_ptr.vmem [resolvable:$true] %s14_s7 }
   0x3   :  { %p44_p1 = scmp.lt.u32.totalorder %s40_s10, %s124_s0 }
   0x5   :  { %p46_p2 = pnand %p44_p1, %p41_p0 }
   0x7   :  { %49 = shalt.err (!%p46_p2)
}
   0x8   :  { %s50_s15 = scalar_lea.vmem %s15_s7, 128  ;;  %p55_p4 = scmp.lt.s32.totalorder %s15_s7, %s15_s7 }
   0x9   :  { %p51_p3 = scmp.ne.s32.totalorder %s15_s7, %s50_s15  ;;  %p56_p5 = scmp.lt.s32.totalorder %s50_s15, %s50_s15 }
   0xb   :  { %p57_p6 = por %p56_p5, %p55_p4 }
   0xd   :  { %p58_p7 = pnand %p57_p6, %p51_p3 }
   0xf   :  { %61 = shalt.err (!%p58_p7)
}
  0x10   :  { %17 = dma.hbm_to_vmem [thread:$0]  %s124_s0, 128, %s15_s7, [#allocation3]  }
  0x11   :  { %84 = dma.done.wait [#allocation3], 128  }
  0x12   :  { %85 = vsyncadd [#allocation3], 4294967168  ;;  %s89_s18 = smov [#allocation5]   ;;  %v21_v0 = vld [vmem:[#allocation2] sm:$0xff] }
  0x13   :  { %s29_s19 = sshll.u32 %s89_s18, 4  ;;  %22 = vst [vmem:[#allocation5] sm:$0xff] %v21_v0  ;;  %s30_s19 = int_to_ptr.vmem [resolvable:$true] %s29_s19 }
  0x14   :  { %s62_s20 = scalar_lea.vmem %s30_s19, 128  ;;  %p67_p9 = scmp.lt.s32.totalorder %s30_s19, %s30_s19 }
  0x15   :  { %p63_p8 = scmp.ne.s32.totalorder %s30_s19, %s62_s20  ;;  %p68_p10 = scmp.lt.s32.totalorder %s62_s20, %s62_s20 }
  0x17   :  { %p69_p11 = por %p68_p10, %p67_p9 }
  0x19   :  { %p70_p12 = pnand %p69_p11, %p63_p8 }
  0x1b   :  { %73 = shalt.err (!%p70_p12)
}
  0x1c   :  { %s74_s23 = scalar_lea.hbm %s125_s1, 128 }
  0x1d   :  { %p75_p13 = scmp.ne.s32.totalorder %s125_s1, %s74_s23  ;;  %p78_p0 = scmp.lt.u32.totalorder %s74_s23, %s125_s1 }
  0x1f   :  { %p80_p1 = pnand %p78_p0, %p75_p13 }
  0x21   :  { %83 = shalt.err (!%p80_p1)
}
  0x22   :  { %32 = dma.vmem_to_hbm [thread:$0]  %s30_s19, 128, %s125_s1, [#allocation4]  }
  0x23   :  { %86 = dma.done.wait [#allocation4], 128  }
  0x24   :  { %87 = vsyncadd [#allocation4], 4294967168 }
  0x25   :  { %36 = vsyncpa [#allocation3], 1 }
  0x26   :  { %37 = vsyncpa [#allocation4], 1 }

// kernel: tpu_custom_call.1
= control target key start
LH: loop header
LB: loop body
LE: loop exit
PB: predicated region body
PF: predicated region fallthrough
CT: control target
= control target key end

     0   :  { %13 = vsyncpa [#allocation3], 0  ;;  %s3498_s0 = inlined_call_operand.vmem [shape: bf16[2,2,2,9,9,4], index: 0, kind: input, shape index: {}]   ;;  %s3499_s1 = inlined_call_operand.vmem [shape: bf16[9,4,128], index: 1, kind: input, shape index: {}]   ;;  %s3500_s2 = inlined_call_operand.vmem [shape: bf16[4,128], index: 2, kind: input, shape index: {}]   ;;  %s3501_s3 = inlined_call_operand.hbm [shape: bf16[2,8,8,128], index: 3, kind: output, shape index: {0}]   ;;  %s3502_s4 = inlined_call_operand.hbm [shape: f32[2,1,128], index: 4, kind: output, shape index: {1}]   ;;  %s3503_s5 = inlined_call_operand.hbm [shape: f32[2,1,128], index: 5, kind: output, shape index: {2}]   ;;  %s3504_s6 = inlined_call_operand.hbm [shape: f32[2,1,128], index: 6, kind: output, shape index: {3}]   ;;  %s3505_s7 = inlined_call_operand.hbm [shape: f32[2,1,128], index: 7, kind: output, shape index: {4}]  }
   0x1   :  { %15 = vsyncpa [#allocation3 + $0x1], 0 }
   0x2   :  { %16 = vsyncpa [#allocation5], 0 }
   0x3   :  { %18 = vsyncpa [#allocation5 + $0x1], 0 }
   0x4   :  { %19 = vsyncpa [#allocation8], 0 }
   0x5   :  { %21 = vsyncpa [#allocation8 + $0x1], 0  ;;  %s2917_s24 = smov 0   ;;  %s2919_s25 = smov 0  }
   0x6   :  { %s2921_s26 = smov 0   ;;  %s2923_s27 = smov 0  }
   0x7 LB: > { %s2938_s28 = sadd.s32 4294967295, %s2868_s27   ;;  %s3506_s29 = sadd.s32 4294967294, %s2868_s27   ;;  %s2868_s27 = sphi %s2923_s27, %s3521_s27   ;;  %s2864_s26 = sphi %s2921_s26, %s3520_s26   ;;  %s2860_s25 = sphi %s2919_s25, %s3519_s25   ;;  %s2856_s24 = sphi %s2917_s24, %s3518_s24  }
   0x8   : > { %s2942_s30 = sadd.s32 1, %s2868_s27   ;;  %s102_s8 = sadd.s32 1, %s2864_s26 }
   0x9   : > { %s99_s9 = ssub.s32 %s2868_s27, %s2942_s30  ;;  %p112_p0 = scmp.ne.s32.totalorder %s2864_s26, %s2860_s25 }
   0xa   : > { %p100_p1 = scmp.eq.s32.totalorder %s99_s9, 0  ;;  %p113_p2 = scmp.eq.s32.totalorder %s2938_s28, 1 }
   0xb   : > { %p118_p3 = scmp.ne.s32.totalorder %s2860_s25, %s2856_s24  ;;  %p119_p4 = scmp.eq.s32.totalorder %s3506_s29, 1 }
   0xc   : > { %s2955_s10 = scalar_select %p100_p1, %s2864_s26, %s102_s8  }
   0xd   : > { %p2957_p5 = por %p113_p2, %p112_p0  ;;  %p2961_p6 = por %p119_p4, %p118_p3 }
   0xe   : > { %p2168_p7 = scmp.ge.s32.totalorder %s2868_s27, 1  ;;  %p255_p8 = scmp.lt.s32.totalorder %s2868_s27, 3 }
  0x10   : > { %p256_p9 = pnand %p2168_p7, %p255_p8 }
  0x11   : > { %vm362_vm0 = vcmask (!%p256_p9), 1041408   ;;  %v2230_v0 = vld [vmem:[%s3499_s1 + $0x8] sm:$0x3] (!%p256_p9)  ;;  %v2179_v1 = vld [vmem:[%s3499_s1 + $0x2] sm:$0x3] (!%p256_p9)  ;;  %p303_p10 = scmp.lt.s32.totalorder (!%p256_p9), %s2938_s28, 1 }
  0x12   : > { %259 = sbr.rel (%p256_p9) target bundleno = 460 (0x1cc), region = 32  ;;  %2590 = vmatprep.subr.msk.bf16.mxu0 (!%p256_p9), %vm362_vm0, %v2230_v0  ;;  %2586 = vmatprep.subr.msk.bf16.mxu1 (!%p256_p9), %vm362_vm0, %v2179_v1  ;;  %v927_v2 = vsel (!%p256_p9), %vm362_vm0, %v2230_v0, 0  ;;  %v364_v3 = vsel (!%p256_p9), %vm362_vm0, %v2179_v1, 0  ;;  %v2255_v4 = vld [vmem:[%s3499_s1 + $0xa] sm:$0x3] (!%p256_p9)  ;;  %vm349_vm1 = vcmask (!%p256_p9), 31744  }
  0x13   : > { %2463 = vmatpush3.bf16.msra.mxu0 (!%p256_p9), %v927_v2  ;;  %2423 = vmatpush3.bf16.msra.mxu1 (!%p256_p9), %v364_v3  ;;  %v317_v5 = vld [vmem:[%s3499_s1] sm:$0x3] (!%p256_p9)  ;;  %v2272_v6 = vld [vmem:[%s3499_s1 + $0xc] sm:$0x3] (!%p256_p9)  ;;  %v1157_v7 = vsel (!%p256_p9), %vm362_vm0, %v2255_v4, 0  ;;  %s3209_s9 = sand.u32 (!%p256_p9), 1, %s2860_s25  }
  0x14   : > { %2591 = vmatprep.subr.msk.bf16.mxu0 (!%p256_p9), %vm362_vm0, %v2255_v4  ;;  %2587 = vmatprep.subr.msk.bf16.mxu1 (!%p256_p9), %vm362_vm0, %v317_v5  ;;  %v464_v8 = vsel (!%p256_p9), %vm362_vm0, %v317_v5, 0  ;;  %v2998_v9 = vsel (!%p256_p9), %vm362_vm0, %v2272_v6, 0  ;;  %v2196_v14 = vld [vmem:[%s3499_s1 + $0x4] sm:$0x3] (!%p256_p9)  ;;  %vm547_vm2 = vsmask.f32 (!%p256_p9), 3328 }
  0x15   : > { %vm548_vm3 = vsmask.f32 (!%p256_p9), 7440  ;;  %v689_v56 = vsel (!%p256_p9), %vm362_vm0, %v2196_v14, 0  ;;  %v3043_v58 = vld [vmem:[%s3499_s1 + $0xe] sm:$0x3] (!%p256_p9)  ;;  %s2169_s13 = sshll.u32 (!%p256_p9), %s3209_s9, 5 }
  0x16   : > { %vm3034_vm4 = vmor (!%p256_p9), %vm547_vm2, %vm548_vm3  ;;  %v3048_v59 = vld [vmem:[%s3499_s1 + $0x6] sm:$0x3] (!%p256_p9)  ;;  %s2348_s16 = sshll.u32 (!%p256_p9), %s2938_s28, 9  ;;  %s1916_s20 = scalar_lea.sflag (!%p256_p9), [#allocation3], %s3209_s9 }
  0x17   : > { %s2870_s22 = smov (!%p256_p9), [#allocation2]  }
  0x18   : > { %s2690_s23 = sshll.u32 (!%p256_p9), %s2870_s22, 4  ;;  %s2691_s23 = int_to_ptr.vmem [resolvable:$false] %s2690_s23 }
  0x19   : > { %s304_s19 = scalar_select %p303_p10, %s2938_s28, 1 }
  0x1b   : > { %s2596_s8 = smul.u32 288, %s304_s19  ;;  %s3264_s19 = scalar_lea.hbm %s3501_s3, %s2348_s16 }
  0x1d   : > { %s2993_s14 = scalar_lea.vmem %s3498_s0, %s2596_s8  ;;  %s2692_s8 = scalar_lea.vmem %s2691_s23, 1024 }
  0x1e   : > { %v2658_v10 = vld [vmem:[%s2993_s14 + $0x48] ss:$8 sps:$4 sm:$0xff]   ;;  %v2659_v11 = vld [vmem:[%s2993_s14 + $0xd8] ss:$8 sps:$4 sm:$0xff]   ;;  %v2240_v21 = vld [vmem:[%s2993_s14 + $0x94] sm:$0x1] }
  0x1f   : > { %2424 = vmatprep.mubr.msk.bf16.mxu1 %vm349_vm1, %v2658_v10  ;;  %v2660_v12 = vld [vmem:[%s2993_s14 + $0x58] ss:$8 sps:$4 sm:$0xff]   ;;  %2464 = vmatprep.mubr.msk.bf16.mxu0 %vm349_vm1, %v2659_v11  ;;  %v2661_v13 = vld [vmem:[%s2993_s14 + $0xe8] ss:$8 sps:$4 sm:$0xff]   ;;  %v2242_v23 = vld [vmem:[%s2993_s14 + $0x9c] sm:$0x1] }
  0x20   : > { %2425 = vmatmul.mubr.msk.bf16.vlgmr.msra.gmra.mrb[0].mxu1 %vm349_vm1, %v2660_v12  ;;  %v2662_v15 = vld [vmem:[%s2993_s14 + $0x68] ss:$8 sps:$4 sm:$0xff]   ;;  %2465 = vmatmul.mubr.msk.bf16.vlgmr.msra.gmra.mrb[0].mxu0 %vm349_vm1, %v2661_v13  ;;  %v2663_v16 = vld [vmem:[%s2993_s14 + $0xf8] ss:$8 sps:$4 sm:$0xff]   ;;  %v1028_v26 = vshll.u32 %v2240_v21, 16  ;;  %v1042_v29 = vshll.u32 %v2242_v23, 16 }
  0x21   : > { %2433 = vmatpush3.bf16.msra.mxu1 %v464_v8  ;;  %2473 = vmatpush3.bf16.msra.mxu0 %v1157_v7  ;;  %v2664_v17 = vld [vmem:[%s2993_s14 + $0x78] ss:$8 sps:$4 sm:$0xff]   ;;  %v2665_v18 = vld [vmem:[%s2993_s14 + $0x108] ss:$8 sps:$4 sm:$0xff]   ;;  %v2244_v37 = vld [vmem:[%s2993_s14 + $0xa4] sm:$0x1] }
  0x22   : > { %2428 = vmatprep.mubr.msk.bf16.mxu1 %vm349_vm1, %v2662_v15  ;;  %2468 = vmatprep.mubr.msk.bf16.mxu0 %vm349_vm1, %v2663_v16  ;;  %v2666_v19 = vld [vmem:[%s2993_s14] ss:$8 sps:$4 sm:$0xff]   ;;  %v2239_v20 = vld [vmem:[%s2993_s14 + $0x90] sm:$0xf]  ;;  %v2241_v22 = vld [vmem:[%s2993_s14 + $0x98] sm:$0xf] }
  0x23   : > { %2592 = vmatprep.subr.msk.bf16.mxu0 %vm362_vm0, %v2272_v6  ;;  %2588 = vmatprep.subr.msk.bf16.mxu1 %vm362_vm0, %v2196_v14  ;;  %v1019_v24 = vshrl.u32 %v2239_v20, 16  ;;  %v1022_v25 = vshll.u32 %v2239_v20, 16  ;;  %v1033_v27 = vshrl.u32 %v2241_v22, 16  ;;  %v1036_v28 = vshll.u32 %v2241_v22, 16  ;;  %v2243_v36 = vld [vmem:[%s2993_s14 + $0xa0] sm:$0xf] }
  0x24   : > { %v1030_v32 = vrot.slane %v1028_v26, 5  ;;  %v1044_v35 = vrot.slane %v1042_v29, 5  ;;  %v2667_v39 = vld [vmem:[%s2993_s14 + $0x10] ss:$8 sps:$4 sm:$0xff]   ;;  %v2245_v40 = vld [vmem:[%s2993_s14 + $0xa8] sm:$0xf] }
  0x25   : > { %v1021_v30 = vrot.slane %v1019_v24, 4  ;;  %v1024_v31 = vrot.slane %v1022_v25, 5  ;;  %v1035_v33 = vrot.slane %v1033_v27, 4  ;;  %v1038_v34 = vrot.slane %v1036_v28, 5  ;;  %v2246_v41 = vld [vmem:[%s2993_s14 + $0xac] sm:$0x1] }
  0x26   : > { %v1047_v42 = vshrl.u32 %v2243_v36, 16  ;;  %v1050_v43 = vshll.u32 %v2243_v36, 16  ;;  %v1056_v46 = vshll.u32 %v2244_v37, 16  ;;  %v1061_v47 = vshrl.u32 %v2245_v40, 16  ;;  %v2668_v57 = vld [vmem:[%s2993_s14 + $0x20] ss:$8 sps:$4 sm:$0xff]  }
  0x27   : > { %v1025_v38 = vor.u32 %v1024_v31, %v1021_v30  ;;  %v1039_v45 = vor.u32 %v1038_v34, %v1035_v33  ;;  %v1064_v48 = vshll.u32 %v2245_v40, 16  ;;  %v1070_v52 = vshll.u32 %v2246_v41, 16  ;;  %v2247_v0 = vld [vmem:[%s2993_s14 + $0xb0] sm:$0xf]  ;;  %v2248_v1 = vld [vmem:[%s2993_s14 + $0xb4] sm:$0x1] }
  0x28   : > { %2429 = vmatmul.mubr.msk.bf16.gmra.mrb[4].mxu1 %vm349_vm1, %v2664_v17  ;;  %2469 = vmatmul.mubr.msk.bf16.gmra.mrb[4].mxu0 %vm349_vm1, %v2665_v18  ;;  %v1049_v50 = vrot.slane %v1047_v42, 4  ;;  %v1052_v51 = vrot.slane %v1050_v43, 5  ;;  %v1063_v54 = vrot.slane %v1061_v47, 4  ;;  %v1058_v62 = vrot.slane %v1056_v46, 5  ;;  %v2249_v4 = vld [vmem:[%s2993_s14 + $0xb8] sm:$0xf] }
  0x29   : > { %2434 = vmatprep.mubr.msk.bf16.mxu1 %vm349_vm1, %v2666_v19  ;;  %v1026_v49 = vrot.slane %v1025_v38, 4  ;;  %v1040_v53 = vrot.slane %v1039_v45, 4  ;;  %v1066_v55 = vrot.slane %v1064_v48, 5  ;;  %v1072_v63 = vrot.slane %v1070_v52, 5  ;;  %v2250_v5 = vld [vmem:[%s2993_s14 + $0xbc] sm:$0x1] }
  0x2a   : > { %v1053_v61 = vor.u32 %v1052_v51, %v1049_v50  ;;  %v1075_v6 = vshrl.u32 %v2247_v0, 16  ;;  %v1078_v7 = vshll.u32 %v2247_v0, 16  ;;  %v1084_v11 = vshll.u32 %v2248_v1, 16  ;;  %v2669_v20 = vld [vmem:[%s2993_s14 + $0x30] ss:$8 sps:$4 sm:$0xff]  }
  0x2b   : > { %v1031_v60 = vsel %vm3034_vm4, %v1026_v49, %v1030_v32  ;;  %v1045_v2 = vsel %vm3034_vm4, %v1040_v53, %v1044_v35  ;;  %v1067_v3 = vor.u32 %v1066_v55, %v1063_v54  ;;  %v1089_v12 = vshrl.u32 %v2249_v4, 16  ;;  %v2251_v26 = vld [vmem:[%s2993_s14 + $0xc0] sm:$0xf]  ;;  %v2252_v27 = vld [vmem:[%s2993_s14 + $0xc4] sm:$0x1] }
  0x2c   : > { %v2256_v8 = vcombine.low %v1031_v60, %v1045_v2  ;;  %v1054_v10 = vrot.slane %v1053_v61, 4  ;;  %v1077_v14 = vrot.slane %v1075_v6, 4  ;;  %v1080_v15 = vrot.slane %v1078_v7, 5  ;;  %v2253_v30 = vld [vmem:[%s2993_s14 + $0xc8] sm:$0xf] }
  0x2d   : > { %v1068_v13 = vrot.slane %v1067_v3, 4  ;;  %v1092_v16 = vshll.u32 %v2249_v4, 16  ;;  %v1091_v18 = vrot.slane %v1089_v12, 4  ;;  %v1098_v19 = vshll.u32 %v2250_v5, 16  ;;  %v2254_v31 = vld [vmem:[%s2993_s14 + $0xcc] sm:$0x1] }
  0x2e   : > { %2474 = vmatprep.mubr.msk.bf16.mxu0 %vm349_vm1, %v2256_v8  ;;  %v1059_v17 = vsel %vm3034_vm4, %v1054_v10, %v1058_v62  ;;  %v3066_v21 = vsel %vm362_vm0, %v3043_v58, 0  ;;  %v1081_v23 = vor.u32 %v1080_v15, %v1077_v14  ;;  %v1086_v24 = vrot.slane %v1084_v11, 5  ;;  %v531_v37 = vld [vmem:[%s2993_s14] sm:$0xf]  ;;  %v532_v42 = vld [vmem:[%s2993_s14 + $0x4] sm:$0x1] }
  0x2f   : > { %v1073_v22 = vsel %vm3034_vm4, %v1068_v13, %v1072_v63  ;;  %v1094_v25 = vrot.slane %v1092_v16, 5  ;;  %v1100_v29 = vrot.slane %v1098_v19, 5  ;;  %v1103_v32 = vshrl.u32 %v2251_v26, 16  ;;  %v533_v48 = vld [vmem:[%s2993_s14 + $0x8] sm:$0xf] }
  0x30   : > { %2435 = vmatmul.mubr.msk.bf16.vlgmr.msra.gmra.mrb[0].mxu1 %vm349_vm1, %v2667_v39  ;;  %v2257_v28 = vcombine.low %v1059_v17, %v1073_v22  ;;  %v1082_v33 = vrot.slane %v1081_v23, 4  ;;  %v1106_v35 = vshll.u32 %v2251_v26, 16  ;;  %v1112_v36 = vshll.u32 %v2252_v27, 16  ;;  %v534_v52 = vld [vmem:[%s2993_s14 + $0xc] sm:$0x1] }
  0x31   : > { %2443 = vmatpush3.bf16.msra.mxu1 %v689_v56  ;;  %2438 = vmatprep.mubr.msk.bf16.mxu1 %vm349_vm1, %v2668_v57  ;;  %v1095_v34 = vor.u32 %v1094_v25, %v1091_v18  ;;  %v1105_v38 = vrot.slane %v1103_v32, 4  ;;  %v1117_v39 = vshrl.u32 %v2253_v30, 16  ;;  %v1120_v40 = vshll.u32 %v2253_v30, 16  ;;  %v535_v63 = vld [vmem:[%s2993_s14 + $0x10] sm:$0xf] }
  0x32   : > { %2589 = vmatprep.subr.msk.bf16.mxu1 %vm362_vm0, %v3048_v59  ;;  %2475 = vmatmul.mubr.msk.bf16.vlgmr.msra.gmra.mrb[0].mxu0 %vm349_vm1, %v2257_v28  ;;  %v1126_v41 = vshll.u32 %v2254_v31, 16  ;;  %v1087_v43 = vsel %vm3034_vm4, %v1082_v33, %v1086_v24  ;;  %v1108_v46 = vrot.slane %v1106_v35, 5  ;;  %v1114_v47 = vrot.slane %v1112_v36, 5  ;;  %v536_v4 = vld [vmem:[%s2993_s14 + $0x14] sm:$0x1] }
  0x33   : > { %2483 = vmatpush3.bf16.msra.mxu0 %v2998_v9  ;;  %v1096_v45 = vrot.slane %v1095_v34, 4  ;;  %v1119_v49 = vrot.slane %v1117_v39, 4  ;;  %v1122_v50 = vrot.slane %v1120_v40, 5  ;;  %v551_v53 = vshrl.u32 %v531_v37, 16  ;;  %v2670_v7 = vld [vmem:[%s2993_s14 + $0x8] ss:$8 sps:$4 sm:$0xff]  }
  0x34   : > { %v1128_v51 = vrot.slane %v1126_v41, 5  ;;  %2593 = vmatprep.subr.msk.bf16.mxu0 %vm362_vm0, %v3043_v58  ;;  %v1109_v54 = vor.u32 %v1108_v46, %v1105_v38  ;;  %v554_v55 = vshll.u32 %v531_v37, 16  ;;  %v560_v56 = vshll.u32 %v532_v42, 16  ;;  %v537_v8 = vld [vmem:[%s2993_s14 + $0x18] sm:$0xf] }
  0x35   : > { %v1101_v9 = vsel %vm3034_vm4, %v1096_v45, %v1100_v29  ;;  %v1123_v60 = vor.u32 %v1122_v50, %v1119_v49  ;;  %v553_v61 = vrot.slane %v551_v53, 4  ;;  %v565_v62 = vshrl.u32 %v533_v48, 16  ;;  %v538_v14 = vld [vmem:[%s2993_s14 + $0x1c] sm:$0x1]  ;;  %v539_v25 = vld [vmem:[%s2993_s14 + $0x20] sm:$0xf] }
  0x36   : > { %v2258_v57 = vcombine.low %v1087_v43, %v1101_v9  ;;  %v1110_v0 = vrot.slane %v1109_v54, 4  ;;  %v556_v1 = vrot.slane %v554_v55, 5  ;;  %v562_v2 = vrot.slane %v560_v56, 5  ;;  %v540_v30 = vld [vmem:[%s2993_s14 + $0x24] sm:$0x1] }
  0x37   : > { %v568_v3 = vshll.u32 %v533_v48, 16  ;;  %v1124_v58 = vrot.slane %v1123_v60, 4  ;;  %v567_v5 = vrot.slane %v565_v62, 4  ;;  %v574_v6 = vshll.u32 %v534_v52, 16  ;;  %v541_v34 = vld [vmem:[%s2993_s14 + $0x28] sm:$0xf] }
  0x38   : > { %2439 = vmatmul.mubr.msk.bf16.gmra.mrb[4].mxu1 %vm349_vm1, %v2669_v20  ;;  %2478 = vmatprep.mubr.msk.bf16.mxu0 %vm349_vm1, %v2258_v57  ;;  %v579_v10 = vshrl.u32 %v535_v63, 16  ;;  %v1115_v11 = vsel %vm3034_vm4, %v1110_v0, %v1114_v47  ;;  %v557_v12 = vor.u32 %v556_v1, %v553_v61  ;;  %v582_v15 = vshll.u32 %v535_v63, 16  ;;  %v542_v35 = vld [vmem:[%s2993_s14 + $0x2c] sm:$0x1]  ;;  %v2671_v43 = vld [vmem:[%s2993_s14 + $0x18] ss:$8 sps:$4 sm:$0xff]  }
  0x39   : > { %v570_v13 = vrot.slane %v568_v3, 5  ;;  %v1129_v16 = vsel %vm3034_vm4, %v1124_v58, %v1128_v51  ;;  %v576_v17 = vrot.slane %v574_v6, 5  ;;  %v588_v19 = vshll.u32 %v536_v4, 16  ;;  %v2672_v51 = vld [vmem:[%s2993_s14 + $0x28] ss:$8 sps:$4 sm:$0xff]  }
  0x3a   : > { %v581_v18 = vrot.slane %v579_v10, 4  ;;  %v2259_v20 = vcombine.low %v1115_v11, %v1129_v16  ;;  %v558_v22 = vrot.slane %v557_v12, 4  ;;  %v584_v24 = vrot.slane %v582_v15, 5  ;;  %v543_v52 = vld [vmem:[%s2993_s14 + $0x30] sm:$0xf] }
  0x3b   : > { %v571_v23 = vor.u32 %v570_v13, %v567_v5  ;;  %v590_v26 = vrot.slane %v588_v19, 5  ;;  %v593_v27 = vshrl.u32 %v537_v8, 16  ;;  %v596_v28 = vshll.u32 %v537_v8, 16  ;;  %v544_v56 = vld [vmem:[%s2993_s14 + $0x34] sm:$0x1] }
  0x3c   : > { %v602_v29 = vshll.u32 %v538_v14, 16  ;;  %2479 = vmatmul.mubr.msk.bf16.gmra.mrb[4].mxu0 %vm349_vm1, %v2259_v20  ;;  %v563_v31 = vsel %vm3034_vm4, %v558_v22, %v562_v2  ;;  %v585_v33 = vor.u32 %v584_v24, %v581_v18  ;;  %v607_v36 = vshrl.u32 %v539_v25, 16  ;;  %v545_v63 = vld [vmem:[%s2993_s14 + $0x38] sm:$0xf]  ;;  %v546_v0 = vld [vmem:[%s2993_s14 + $0x3c] sm:$0x1] }
  0x3d   : > { %v572_v32 = vrot.slane %v571_v23, 4  ;;  %2484 = vmatprep.mubr.msk.bf16.mxu0 %vm349_vm1, %v2670_v7  ;;  %v595_v37 = vrot.slane %v593_v27, 4  ;;  %v598_v38 = vrot.slane %v596_v28, 5  ;;  %v610_v40 = vshll.u32 %v539_v25, 16  ;;  %v2314_v1 = vld [vmem:[%s3499_s1 + $0x10] sm:$0x3] }
  0x3e   : > { %v604_v39 = vrot.slane %v602_v29, 5  ;;  %v586_v42 = vrot.slane %v585_v33, 4  ;;  %v609_v45 = vrot.slane %v607_v36, 4  ;;  %v616_v46 = vshll.u32 %v540_v30, 16  ;;  %v1753_v15 = vld [vmem:[%s3500_s2] sm:$0x3] }
  0x3f   : > { %v577_v41 = vsel %vm3034_vm4, %v572_v32, %v576_v17  ;;  %v599_v48 = vor.u32 %v598_v38, %v595_v37  ;;  %v612_v49 = vrot.slane %v610_v40, 5  ;;  %v621_v50 = vshrl.u32 %v541_v34, 16  ;;  %v2673_v20 = vld [vmem:[%s2993_s14 + $0x38] ss:$8 sps:$4 sm:$0xff]   ;;  %v2298_v37 = vld [vmem:[%s2993_s14 + $0x8] sm:$0xf] }
  0x40   : > { %v2197_v47 = vcombine.low %v563_v31, %v577_v41  ;;  %v808_v53 = vsel %vm362_vm0, %v3048_v59, 0  ;;  %v618_v9 = vrot.slane %v616_v46, 5  ;;  %v624_v54 = vshll.u32 %v541_v34, 16  ;;  %v2675_v23 = vld [vmem:[%s2993_s14 + $0x50] ss:$8 sps:$4 sm:$0xff]  }
  0x41   : > { %v630_v55 = vshll.u32 %v542_v35, 16  ;;  %v591_v57 = vsel %vm3034_vm4, %v586_v42, %v590_v26  ;;  %v600_v60 = vrot.slane %v599_v48, 4  ;;  %v613_v61 = vor.u32 %v612_v49, %v609_v45  ;;  %v2674_v34 = vld [vmem:[%s2993_s14 + $0x90] ss:$8 sps:$4 sm:$0xff]   ;;  %v2677_v36 = vld [vmem:[%s2993_s14 + $0x60] ss:$8 sps:$4 sm:$0xff]  }
  0x42   : > { %2444 = vmatprep.mubr.msk.bf16.mxu1 %vm349_vm1, %v2197_v47  ;;  %v623_v62 = vrot.slane %v621_v50, 4  ;;  %v626_v2 = vrot.slane %v624_v54, 5  ;;  %v635_v3 = vshrl.u32 %v543_v52, 16  ;;  %v638_v4 = vshll.u32 %v543_v52, 16  ;;  %v2299_v38 = vld [vmem:[%s2993_s14 + $0xc] sm:$0x1] }
  0x43   : > { %v632_v59 = vrot.slane %v630_v55, 5  ;;  %v605_v58 = vsel %vm3034_vm4, %v600_v60, %v604_v39  ;;  %v614_v5 = vrot.slane %v613_v61, 4  ;;  %v644_v6 = vshll.u32 %v544_v56, 16  ;;  %v2300_v39 = vld [vmem:[%s2993_s14 + $0x10] sm:$0xf] }
  0x44   : > { %v649_v7 = vshrl.u32 %v545_v63, 16  ;;  %v2198_v8 = vcombine.low %v591_v57, %v605_v58  ;;  %2485 = vmatmul.mubr.msk.bf16.vlgmr.msra.gmra.mrb[0].mxu0 %vm349_vm1, %v2671_v43  ;;  %v627_v10 = vor.u32 %v626_v2, %v623_v62  ;;  %v637_v11 = vrot.slane %v635_v3, 4  ;;  %v2301_v40 = vld [vmem:[%s2993_s14 + $0x14] sm:$0x1]  ;;  %v2679_v46 = vld [vmem:[%s2993_s14 + $0x70] ss:$8 sps:$4 sm:$0xff]  }
  0x45   : > { %v640_v12 = vrot.slane %v638_v4, 5  ;;  %2493 = vmatpush3.bf16.msra.mxu0 %v3066_v21  ;;  %2488 = vmatprep.mubr.msk.bf16.mxu0 %vm349_vm1, %v2672_v51  ;;  %v652_v14 = vshll.u32 %v545_v63, 16  ;;  %v619_v16 = vsel %vm3034_vm4, %v614_v5, %v618_v9  ;;  %v658_v19 = vshll.u32 %v546_v0, 16  ;;  %v2676_v49 = vld [vmem:[%s2993_s14 + $0xa0] ss:$8 sps:$4 sm:$0xff]  }
  0x46   : > { %v651_v13 = vrot.slane %v649_v7, 4  ;;  %2445 = vmatmul.mubr.msk.bf16.vlgmr.msra.gmra.mrb[0].mxu1 %vm349_vm1, %v2198_v8  ;;  %v628_v17 = vrot.slane %v627_v10, 4  ;;  %2594 = vmatprep.subr.msk.bf16.mxu0 %vm362_vm0, %v2314_v1  ;;  %v646_v21 = vrot.slane %v644_v6, 5  ;;  %v1625_v31 = vsel %vm362_vm0, %v2314_v1, 0  ;;  %v2302_v9 = vld [vmem:[%s2993_s14 + $0x18] sm:$0xf] }
  0x47   : > { %v641_v18 = vor.u32 %v640_v12, %v637_v11  ;;  %2453 = vmatpush3.bf16.msra.mxu1 %v808_v53  ;;  %v654_v22 = vrot.slane %v652_v14, 5  ;;  %v660_v28 = vrot.slane %v658_v19, 5  ;;  %v1787_v32 = vsel %vm362_vm0, %v1753_v15, 0  ;;  %v2678_v54 = vld [vmem:[%s2993_s14 + $0xb0] ss:$8 sps:$4 sm:$0xff]  }
  0x48   : > { %v633_v24 = vsel %vm3034_vm4, %v628_v17, %v632_v59  ;;  %2595 = vmatprep.subr.msk.bf16.mxu1 %vm362_vm0, %v1753_v15  ;;  %v1487_v41 = vshrl.u32 %v2298_v37, 16  ;;  %v1490_v42 = vshll.u32 %v2298_v37, 16  ;;  %v1496_v43 = vshll.u32 %v2299_v38, 16  ;;  %v2303_v57 = vld [vmem:[%s2993_s14 + $0x1c] sm:$0x1] }
  0x49   : > { %v642_v25 = vrot.slane %v641_v18, 4  ;;  %v2199_v26 = vcombine.low %v619_v16, %v633_v24  ;;  %v655_v27 = vor.u32 %v654_v22, %v651_v13  ;;  %v1501_v45 = vshrl.u32 %v2300_v39, 16  ;;  %v2304_v60 = vld [vmem:[%s2993_s14 + $0x20] sm:$0xf]  ;;  %v2305_v62 = vld [vmem:[%s2993_s14 + $0x24] sm:$0x1] }
  0x4a   : > { %v1504_v47 = vshll.u32 %v2300_v39, 16  ;;  %v1510_v48 = vshll.u32 %v2301_v40, 16  ;;  %v1489_v50 = vrot.slane %v1487_v41, 4  ;;  %v1492_v51 = vrot.slane %v1490_v42, 5  ;;  %v2681_v8 = vld [vmem:[%s2993_s14 + $0x80] ss:$8 sps:$4 sm:$0xff]  }
  0x4b   : > { %2448 = vmatprep.mubr.msk.bf16.mxu1 %vm349_vm1, %v2199_v26  ;;  %v647_v29 = vsel %vm3034_vm4, %v642_v25, %v646_v21  ;;  %v656_v30 = vrot.slane %v655_v27, 4  ;;  %v1498_v52 = vrot.slane %v1496_v43, 5  ;;  %v1503_v53 = vrot.slane %v1501_v45, 4  ;;  %v2306_v16 = vld [vmem:[%s2993_s14 + $0x28] sm:$0xf] }
  0x4c   : > { %2489 = vmatmul.mubr.msk.bf16.gmra.mrb[4].mxu0 %vm349_vm1, %v2673_v20  ;;  %v1506_v55 = vrot.slane %v1504_v47, 5  ;;  %v1512_v56 = vrot.slane %v1510_v48, 5  ;;  %v1493_v61 = vor.u32 %v1492_v51, %v1489_v50  ;;  %v1515_v63 = vshrl.u32 %v2302_v9, 16  ;;  %v2307_v17 = vld [vmem:[%s2993_s14 + $0x2c] sm:$0x1] }
  0x4d   : > { %v661_v33 = vsel %vm3034_vm4, %v656_v30, %v660_v28  ;;  %2494 = vmatprep.mubr.msk.bf16.mxu0 %vm349_vm1, %v2675_v23  ;;  %v1518_v0 = vshll.u32 %v2302_v9, 16  ;;  %v1524_v1 = vshll.u32 %v2303_v57, 16  ;;  %v1529_v59 = vshrl.u32 %v2304_v60, 16  ;;  %v2308_v18 = vld [vmem:[%s2993_s14 + $0x30] sm:$0xf] }
  0x4e   : > { %v2200_v35 = vcombine.low %v647_v29, %v661_v33  ;;  %v1507_v2 = vor.u32 %v1506_v55, %v1503_v53  ;;  %v1532_v3 = vshll.u32 %v2304_v60, 16  ;;  %v1538_v4 = vshll.u32 %v2305_v62, 16  ;;  %v2309_v21 = vld [vmem:[%s2993_s14 + $0x34] sm:$0x1]  ;;  %v2680_v24 = vld [vmem:[%s2993_s14 + $0xc0] ss:$8 sps:$4 sm:$0xff]  }
  0x4f   : > { %v1494_v58 = vrot.slane %v1493_v61, 4  ;;  %v1517_v5 = vrot.slane %v1515_v63, 4  ;;  %v1520_v6 = vrot.slane %v1518_v0, 5  ;;  %v1526_v7 = vrot.slane %v1524_v1, 5  ;;  %v2682_v29 = vld [vmem:[%s2993_s14 + $0xd8] ss:$8 sps:$4 sm:$0xff]  }
  0x50   : > { %2449 = vmatmul.mubr.msk.bf16.gmra.mrb[4].mxu1 %vm349_vm1, %v2200_v35  ;;  %v1508_v10 = vrot.slane %v1507_v2, 4  ;;  %v1531_v11 = vrot.slane %v1529_v59, 4  ;;  %v1534_v12 = vrot.slane %v1532_v3, 5  ;;  %v1540_v13 = vrot.slane %v1538_v4, 5  ;;  %v2310_v38 = vld [vmem:[%s2993_s14 + $0x38] sm:$0xf] }
  0x51   : > { %2454 = vmatprep.mubr.msk.bf16.mxu1 %vm349_vm1, %v2674_v34  ;;  %v1499_v14 = vsel %vm3034_vm4, %v1494_v58, %v1498_v52  ;;  %v1521_v15 = vor.u32 %v1520_v6, %v1517_v5  ;;  %v1543_v22 = vshrl.u32 %v2306_v16, 16  ;;  %v1546_v23 = vshll.u32 %v2306_v16, 16  ;;  %v2311_v42 = vld [vmem:[%s2993_s14 + $0x3c] sm:$0x1]  ;;  %v2312_v43 = vld [vmem:[%s2993_s14 + $0x40] sm:$0xf] }
  0x52   : > { %v1513_v19 = vsel %vm3034_vm4, %v1508_v10, %v1512_v56  ;;  %v1535_v20 = vor.u32 %v1534_v12, %v1531_v11  ;;  %v1552_v27 = vshll.u32 %v2307_v17, 16  ;;  %v1557_v28 = vshrl.u32 %v2308_v18, 16  ;;  %v2313_v47 = vld [vmem:[%s2993_s14 + $0x44] sm:$0x1]  ;;  %v2683_v2 = vld [vmem:[%s2993_s14 + $0xe8] ss:$8 sps:$4 sm:$0xff]  }
  0x53   : > { %v2315_v25 = vcombine.low %v1499_v14, %v1513_v19  ;;  %v1522_v26 = vrot.slane %v1521_v15, 4  ;;  %v1560_v33 = vshll.u32 %v2308_v18, 16  ;;  %v1566_v37 = vshll.u32 %v2309_v21, 16  ;;  %v2684_v5 = vld [vmem:[%s2993_s14 + $0xf8] ss:$8 sps:$4 sm:$0xff]  }
  0x54   : > { %2495 = vmatmul.mubr.msk.bf16.vlgmr.msra.gmra.mrb[0].mxu0 %vm349_vm1, %v2677_v36  ;;  %v1536_v30 = vrot.slane %v1535_v20, 4  ;;  %v1554_v35 = vrot.slane %v1552_v27, 5  ;;  %v1559_v36 = vrot.slane %v1557_v28, 4  ;;  %v1571_v45 = vshrl.u32 %v2310_v38, 16  ;;  %v2685_v11 = vld [vmem:[%s2993_s14 + $0x108] ss:$8 sps:$4 sm:$0xff]  }
  0x55   : > { %2503 = vmatpush3.bf16.msra.mxu0 %v1625_v31  ;;  %2498 = vmatprep.mubr.msk.bf16.mxu0 %vm349_vm1, %v2679_v46  ;;  %v1545_v31 = vrot.slane %v1543_v22, 4  ;;  %v1527_v34 = vsel %vm3034_vm4, %v1522_v26, %v1526_v7  ;;  %v1562_v41 = vrot.slane %v1560_v33, 5  ;;  %v1568_v46 = vrot.slane %v1566_v37, 5  ;;  %s3232_s14 = scalar_lea.vmem [#allocation2], %s2169_s13 }
  0x56   : > { %v1541_v39 = vsel %vm3034_vm4, %v1536_v30, %v1540_v13  ;;  %v1574_v48 = vshll.u32 %v2310_v38, 16  ;;  %v1573_v52 = vrot.slane %v1571_v45, 4  ;;  %v1585_v53 = vshrl.u32 %v2312_v43, 16  ;;  %s1945_s15 = sshll.u32 %s3232_s14, 4  ;;  %s3266_s15 = int_to_ptr.vmem [resolvable:$true] %s1945_s15 }
  0x57   : > { %v1563_v51 = vor.u32 %v1562_v41, %v1559_v36  ;;  %v2316_v9 = vcombine.low %v1527_v34, %v1541_v39  ;;  %v1588_v55 = vshll.u32 %v2312_v43, 16  ;;  %v1594_v56 = vshll.u32 %v2313_v47, 16  ;;  %s2686_s21 = scalar_lea.vmem %s3266_s15, 512  ;;  %p2693_p0 = scmp.lt.s32.totalorder %s3266_s15, %s2691_s23 }
  0x58   : > { %2455 = vmatmul.mubr.msk.bf16.vlgmr.msra.gmra.mrb[0].mxu1 %vm349_vm1, %v2676_v49  ;;  %v1580_v49 = vshll.u32 %v2311_v42, 16  ;;  %v1587_v61 = vrot.slane %v1585_v53, 4  ;;  %p2687_p11 = scmp.ne.s32.totalorder %s3266_s15, %s2686_s21  ;;  %p2694_p1 = scmp.lt.s32.totalorder %s2692_s8, %s2686_s21 }
  0x59   : > { %2513 = vmatpush3.bf16.msra.mxu1 %v1787_v32  ;;  %2458 = vmatprep.mubr.msk.bf16.mxu1 %vm349_vm1, %v2678_v54  ;;  %v1548_v32 = vrot.slane %v1546_v23, 5  ;;  %v1576_v54 = vrot.slane %v1574_v48, 5  ;;  %v1564_v60 = vrot.slane %v1563_v51, 4  ;;  %v1590_v0 = vrot.slane %v1588_v55, 5 }
  0x5a   : > { %v1582_v63 = vrot.slane %v1580_v49, 5  ;;  %v1596_v58 = vrot.slane %v1594_v56, 5  ;;  %p2688_p12 = pnand %p2687_p11, %p2957_p5  ;;  %p2695_p2 = por %p2694_p1, %p2693_p0 }
  0x5b   : > { %v1549_v40 = vor.u32 %v1548_v32, %v1545_v31  ;;  %v1577_v62 = vor.u32 %v1576_v54, %v1573_v52  ;;  %v1569_v1 = vsel %vm3034_vm4, %v1564_v60, %v1568_v46  ;;  %v1591_v4 = vor.u32 %v1590_v0, %v1587_v61 }
  0x5c   : > { %2499 = vmatmul.mubr.msk.bf16.gmra.mrb[4].mxu0 %vm349_vm1, %v2681_v8  ;;  %p2689_p13 = pneg %p2688_p12 }
  0x5d   : > { %2504 = vmatprep.mubr.msk.bf16.mxu0 %vm349_vm1, %v2315_v25  ;;  %v1550_v50 = vrot.slane %v1549_v40, 4  ;;  %v1578_v3 = vrot.slane %v1577_v62, 4  ;;  %v1592_v7 = vrot.slane %v1591_v4, 4 }
  0x5e   : > { %p2696_p3 = pnand %p2695_p2, %p2689_p13 }
  0x5f   : > { %v1555_v57 = vsel %vm3034_vm4, %v1550_v50, %v1554_v35  ;;  %v1583_v6 = vsel %vm3034_vm4, %v1578_v3, %v1582_v63  ;;  %v1597_v8 = vsel %vm3034_vm4, %v1592_v7, %v1596_v58 }
  0x60   : > { %2459 = vmatmul.mubr.msk.bf16.gmra.mrb[4].mxu1 %vm349_vm1, %v2680_v24  ;;  %v2317_v59 = vcombine.low %v1555_v57, %v1569_v1  ;;  %v2318_v10 = vcombine.low %v1583_v6, %v1597_v8 }
  0x61   : > { %2514 = vmatprep.mubr.msk.bf16.mxu1 %vm349_vm1, %v2682_v29 }
  0x64   : > { %2505 = vmatmul.mubr.msk.bf16.vlgmr.msra.gmra.mrb[0].mxu0 %vm349_vm1, %v2316_v9 }
  0x65   : > { %2508 = vmatprep.mubr.msk.bf16.mxu0 %vm349_vm1, %v2317_v59 }
  0x68   : > { %2515 = vmatmul.mubr.msk.bf16.vlgmr.msra.gmra.mrb[8].mxu1 %vm349_vm1, %v2683_v2 }
  0x69   : > { %2518 = vmatprep.mubr.msk.bf16.mxu1 %vm349_vm1, %v2684_v5 }
  0x6c   : > { %2509 = vmatmul.mubr.msk.bf16.gmra.mrb[4].mxu0 %vm349_vm1, %v2318_v10 }
  0x70   : > { %2519 = vmatmul.mubr.msk.bf16.gmra.mrb[12].mxu1 %vm349_vm1, %v2685_v11 }
 0x12b   : > { %v2456_v12 = vpop.f32.mrb[0].mxu1 }
 0x12c   : > { %v844_v13 = vpop.f32.mrb[1].mxu1 }
 0x12d   : > { %v2457_v14 = vpop.f32.mrb[2].mxu1 }
 0x12e   : > { %v847_v15 = vpop.f32.mrb[3].mxu1 }
 0x133   : > { %v2460_v16 = vpop.f32.mrb[4].mxu1 }
 0x134   : > { %v860_v17 = vpop.f32.mrb[5].mxu1 }
 0x135   : > { %v2461_v18 = vpop.f32.mrb[6].mxu1 }
 0x136   : > { %v863_v44 = vpop.f32.mrb[7].mxu1 }
 0x137   : > { %v2506_v19 = vpop.f32.mrb[0].mxu0 }
 0x138   : > { %v3211_v20 = vadd.f32 %v2506_v19, %v2456_v12  ;;  %v1661_v21 = vpop.f32.mrb[1].mxu0 }
 0x139   : > { %v3214_v22 = vadd.f32 %v1661_v21, %v844_v13  ;;  %v2507_v23 = vpop.f32.mrb[2].mxu0 }
 0x13a   : > { %v3216_v24 = vadd.f32 %v2507_v23, %v2457_v14  ;;  %v1664_v25 = vpop.f32.mrb[3].mxu0 }
 0x13b   : > { %v3218_v26 = vpop.f32.mrb[8].mxu1  ;;  %v3220_v27 = vadd.f32 %v1664_v25, %v847_v15 }
 0x13c   : > { %v3222_v28 = vpop.f32.mrb[9].mxu1  ;;  %v2357_v29 = vpack.c.bf16 %v3216_v24, %v3211_v20 }
 0x13d   : > { %v3226_v30 = vpop.f32.mrb[10].mxu1  ;;  %v1700_v31 = vadd.f32 %v3220_v27, %v3214_v22  ;;  %v2352_v32 = vpack.c.bf16 %v3220_v27, %v3214_v22 }
 0x13e   : > { %2369 = vst [vmem:[%s3232_s14 + $0x8] sm:$0xff] %v2357_v29   ;;  %v3235_v33 = vpop.f32.mrb[11].mxu1 }
 0x13f   : > { %v1701_v34 = vadd.f32 %v3211_v20, %v1700_v31  ;;  %2353 = vst [vmem:[%s3232_s14] sm:$0xff] %v2352_v32   ;;  %v1854_v35 = vadd.f32 %v3235_v33, %v3222_v28  ;;  %v2510_v36 = vpop.f32.mrb[4].mxu0 }
 0x140   : > { %v3241_v37 = vadd.f32 %v2510_v36, %v2460_v16  ;;  %v1677_v38 = vpop.f32.mrb[5].mxu0 }
 0x141   : > { %v1855_v39 = vadd.f32 %v3218_v26, %v1854_v35  ;;  %v3245_v40 = vadd.f32 %v1677_v38, %v860_v17  ;;  %v1702_v41 = vadd.f32 %v3216_v24, %v1701_v34  ;;  %v2511_v42 = vpop.f32.mrb[6].mxu0 }
 0x142   : > { %v3249_v43 = vadd.f32 %v2511_v42, %v2461_v18  ;;  %v1680_v45 = vpop.f32.mrb[7].mxu0 }
 0x143   : > { %v3251_v46 = vpop.f32.mrb[12].mxu1  ;;  %v1703_v47 = vadd.f32 %v3245_v40, %v1702_v41  ;;  %v1856_v48 = vadd.f32 %v3226_v30, %v1855_v39  ;;  %v3255_v49 = vadd.f32 %v1680_v45, %v863_v44 }
 0x144   : > { %v3257_v50 = vpop.f32.mrb[13].mxu1  ;;  %v2367_v51 = vpack.c.bf16 %v3249_v43, %v3241_v37 }
 0x145   : > { %v1857_v52 = vadd.f32 %v1856_v48, %v3257_v50  ;;  %v3269_v53 = vpop.f32.mrb[14].mxu1  ;;  %v1704_v9 = vadd.f32 %v3255_v49, %v1703_v47  ;;  %v2362_v54 = vpack.c.bf16 %v3255_v49, %v3245_v40 }
 0x146   : > { %2371 = vst [vmem:[%s3232_s14 + $0x18] sm:$0xff] %v2367_v51   ;;  %v3275_v55 = vpop.f32.mrb[15].mxu1 }
 0x147   : > { %v1705_v56 = vadd.f32 %v3241_v37, %v1704_v9  ;;  %2370 = vst [vmem:[%s3232_s14 + $0x10] sm:$0xff] %v2362_v54   ;;  %v1858_v57 = vadd.f32 %v1857_v52, %v3275_v55 }
 0x148   : > { %2699 = shalt.err (!%p2696_p3)
}
 0x149   : > { %s2700_s13 = scalar_lea.hbm %s3264_s19, 512  ;;  %s2704_s17 = scalar_lea.hbm %s3501_s3, 1024 }
 0x14a   : > { %p2701_p4 = scmp.ne.s32.totalorder %s3264_s19, %s2700_s13  ;;  %p2705_p9 = scmp.lt.u32.totalorder %s3264_s19, %s3501_s3 }
 0x14b   : > { %p2706_p10 = scmp.lt.u32.totalorder %s2704_s17, %s2700_s13  ;;  %p2708_p12 = scmp.lt.u32.totalorder %s2700_s13, %s3264_s19 }
 0x14c   : > { %p2702_p7 = pnand %p2701_p4, %p2957_p5 }
 0x14d   : > { %p2707_p11 = por %p2706_p10, %p2705_p9 }
 0x14e   : > { %p2703_p8 = pneg %p2702_p7 }
 0x14f   : > { %p2709_p13 = por %p2708_p12, %p2707_p11 }
 0x151   : > { %p2710_p0 = pnand %p2709_p13, %p2703_p8 }
 0x153   : > { %2713 = shalt.err (!%p2710_p0)
}
 0x154   : > { %s2871_s21 = smov 64   ;;  %s2872_s23 = smov 4   ;;  %v1706_v60 = vadd.f32 %v3249_v43, %v1705_v56  ;;  %v1859_v61 = vadd.f32 %v3251_v46, %v1858_v57 }
 0x155   : > { %2597 = dma.vmem_to_hbm [thread:$0]  (%p2957_p5), %s3266_s15, 512, %s3264_s19, %s1916_s20, %s2871_s21, %s2871_s21, %s2872_s23  }
 0x156   : > { %v1707_v62 = vrot.slane %v1706_v60, 4  ;;  %v1860_v63 = vadd.f32 %v3269_v53, %v1859_v61  ;;  %s3507_s8 = sand.u32 1, %s2938_s28   ;;  %s3309_s13 = sshll.u32 %s2938_s28, 4 }
 0x157   : > { %s284_s15 = scalar_lea.vmem [#allocation4], %s3209_s9  ;;  %s3316_s16 = scalar_lea.hbm %s3502_s4, %s3309_s13 }
 0x158   : > { %v1708_v0 = vadd.f32 %v1707_v62, %v1706_v60  ;;  %v1861_v1 = vrot.slane %v1860_v63, 4  ;;  %s1961_s19 = sshll.u32 %s284_s15, 4  ;;  %s3508_s17 = scalar_lea.vmem [#allocation7], %s3209_s9  ;;  %s3318_s19 = int_to_ptr.vmem [resolvable:$true] %s1961_s19 }
 0x159   : > { %s3327_s18 = sshll.u32 %s3508_s17, 4  ;;  %s3341_s22 = scalar_lea.sflag [#allocation5], %s3507_s8  ;;  %s3372_s18 = int_to_ptr.vmem [resolvable:$true] %s3327_s18 }
 0x15a   : > { %v1709_v2 = vrot.slane %v1708_v0, 2  ;;  %v1862_v59 = vadd.f32 %v1861_v1, %v1860_v63  ;;  %s2714_s21 = scalar_lea.vmem %s3318_s19, 16  ;;  %s2873_s23 = smov [#allocation4]  }
 0x15b   : > { %p2715_p1 = scmp.ne.s32.totalorder %s3318_s19, %s2714_s21 }
 0x15c   : > { %v1710_v3 = vadd.f32 %v1709_v2, %v1708_v0  ;;  %v1863_v4 = vrot.slane %v1862_v59, 2 }
 0x15d   : > { %p2716_p2 = pnand %p2715_p1, %p2957_p5 }
 0x15e   : > { %v1711_v58 = vrot.slane %v1710_v3, 1  ;;  %v1864_v5 = vadd.f32 %v1863_v4, %v1862_v59 }
 0x15f   : > { %p2717_p3 = pneg %p2716_p2 }
 0x160   : > { %v1712_v6 = vadd.f32 %v1711_v58, %v1710_v3  ;;  %v1865_v7 = vrot.slane %v1864_v5, 1 }
 0x162   : > { %v1713_v8 = vmul.f32 0.015625, %v1712_v6  ;;  %v1866_v10 = vadd.f32 %v1865_v7, %v1864_v5 }
 0x164   : > { %v1714_v11 = vsub.f32 %v3214_v22, %v1713_v8  ;;  %v1715_v12 = vsub.f32 %v3220_v27, %v1713_v8  ;;  %v1716_v13 = vsub.f32 %v3211_v20, %v1713_v8  ;;  %v1717_v14 = vsub.f32 %v3216_v24, %v1713_v8  ;;  %1722 = vst [vmem:[%s284_s15] sm:$0x1] %v1713_v8  ;;  %s2718_s15 = sshll.u32 %s2873_s23, 4  ;;  %s2719_s15 = int_to_ptr.vmem [resolvable:$false] %s2718_s15 }
 0x165   : > { %v1718_v15 = vsub.f32 %v3245_v40, %v1713_v8  ;;  %v3331_v16 = vsub.f32 %v3255_v49, %v1713_v8  ;;  %v3334_v17 = vsub.f32 %v3241_v37, %v1713_v8  ;;  %v3337_v18 = vsub.f32 %v3249_v43, %v1713_v8  ;;  %s2720_s20 = scalar_lea.vmem %s2719_s15, 32  ;;  %p2721_p4 = scmp.lt.s32.totalorder %s3318_s19, %s2719_s15 }
 0x166   : > { %p2722_p7 = scmp.lt.s32.totalorder %s2720_s20, %s2714_s21 }
 0x168   : > { %p2723_p8 = por %p2722_p7, %p2721_p4 }
 0x16a   : > { %p2724_p9 = pnand %p2723_p8, %p2717_p3 }
 0x16c   : > { %2727 = shalt.err (!%p2724_p9)
}
 0x16d   : > { %s2728_s14 = scalar_lea.hbm %s3316_s16, 16  ;;  %s2732_s23 = scalar_lea.hbm %s3502_s4, 32 }
 0x16e   : > { %p2729_p10 = scmp.ne.s32.totalorder %s3316_s16, %s2728_s14  ;;  %p2733_p13 = scmp.lt.u32.totalorder %s3316_s16, %s3502_s4 }
 0x16f   : > { %p2734_p0 = scmp.lt.u32.totalorder %s2732_s23, %s2728_s14  ;;  %p2736_p2 = scmp.lt.u32.totalorder %s2728_s14, %s3316_s16 }
 0x170   : > { %p2730_p11 = pnand %p2729_p10, %p2957_p5 }
 0x171   : > { %p2735_p1 = por %p2734_p0, %p2733_p13 }
 0x172   : > { %p2731_p12 = pneg %p2730_p11 }
 0x173   : > { %p2737_p3 = por %p2736_p2, %p2735_p1 }
 0x175   : > { %p2738_p4 = pnand %p2737_p3, %p2731_p12 }
 0x177   : > { %2741 = shalt.err (!%p2738_p4)
}
 0x178   : > { %2598 = dma.vmem_to_hbm [thread:$0]  (%p2957_p5), %s3318_s19, 16, %s3316_s16, %s3341_s22   ;;  %v1723_v44 = vmul.f32 %v1714_v11, %v1714_v11  ;;  %v1724_v19 = vmul.f32 %v1715_v12, %v1715_v12  ;;  %v1725_v20 = vmul.f32 %v1716_v13, %v1716_v13  ;;  %v1867_v22 = vmul.f32 0.015625, %v1866_v10 }
 0x179   : > { %s3369_s17 = scalar_lea.hbm %s3504_s6, %s3309_s13  ;;  %v1726_v23 = vmul.f32 %v1717_v14, %v1717_v14  ;;  %v1727_v24 = vmul.f32 %v1718_v15, %v1718_v15  ;;  %s3514_s19 = scalar_lea.vmem [#allocation7], %s3209_s9 }
 0x17a   : > { %v1731_v21 = vadd.f32 %v1724_v19, %v1723_v44  ;;  %v1868_v27 = vsub.f32 %v3222_v28, %v1867_v22  ;;  %v1869_v29 = vsub.f32 %v3235_v33, %v1867_v22  ;;  %v1870_v31 = vsub.f32 %v3218_v26, %v1867_v22  ;;  %1876 = vst [vmem:[%s3514_s19] sm:$0x1] %v1867_v22  ;;  %s3515_s16 = sand.u32 1, %s2938_s28   ;;  %s2742_s20 = scalar_lea.vmem %s3372_s18, 16 }
 0x17b   : > { %v1871_v32 = vsub.f32 %v3226_v30, %v1867_v22  ;;  %v1872_v34 = vsub.f32 %v3257_v50, %v1867_v22  ;;  %v1873_v35 = vsub.f32 %v3275_v55, %v1867_v22  ;;  %v1874_v36 = vsub.f32 %v3251_v46, %v1867_v22  ;;  %s3385_s21 = scalar_lea.sflag [#allocation8], %s3515_s16  ;;  %p2743_p7 = scmp.ne.s32.totalorder %s3372_s18, %s2742_s20 }
 0x17c   : > { %v1732_v25 = vadd.f32 %v1731_v21, %v1725_v20  ;;  %s2874_s14 = smov [#allocation7]  }
 0x17d   : > { %p2744_p8 = pnand %p2743_p7, %p2957_p5  ;;  %s2746_s23 = sshll.u32 %s2874_s14, 4  ;;  %s2747_s23 = int_to_ptr.vmem [resolvable:$false] %s2746_s23 }
 0x17e   : > { %s2748_s15 = scalar_lea.vmem %s2747_s23, 32  ;;  %p2749_p10 = scmp.lt.s32.totalorder %s3372_s18, %s2747_s23 }
 0x17f   : > { %p2745_p9 = pneg %p2744_p8  ;;  %p2750_p11 = scmp.lt.s32.totalorder %s2748_s15, %s2742_s20 }
 0x181   : > { %p2751_p12 = por %p2750_p11, %p2749_p10 }
 0x183   : > { %p2752_p13 = pnand %p2751_p12, %p2745_p9 }
 0x185   : > { %2755 = shalt.err (!%p2752_p13)
}
 0x186   : > { %s2756_s28 = scalar_lea.hbm %s3369_s17, 16  ;;  %s2760_s19 = scalar_lea.hbm %s3504_s6, 32 }
 0x187   : > { %p2757_p0 = scmp.ne.s32.totalorder %s3369_s17, %s2756_s28  ;;  %p2761_p3 = scmp.lt.u32.totalorder %s3369_s17, %s3504_s6 }
 0x188   : > { %p2762_p4 = scmp.lt.u32.totalorder %s2760_s19, %s2756_s28  ;;  %p2764_p8 = scmp.lt.u32.totalorder %s2756_s28, %s3369_s17 }
 0x189   : > { %p2758_p1 = pnand %p2757_p0, %p2957_p5 }
 0x18a   : > { %p2763_p7 = por %p2762_p4, %p2761_p3 }
 0x18b   : > { %p2759_p2 = pneg %p2758_p1 }
 0x18c   : > { %p2765_p9 = por %p2764_p8, %p2763_p7 }
 0x18e   : > { %p2766_p10 = pnand %p2765_p9, %p2759_p2 }
 0x190   : > { %2769 = shalt.err (!%p2766_p10)
}
 0x191   : > { %2600 = dma.vmem_to_hbm [thread:$0]  (%p2957_p5), %s3372_s18, 16, %s3369_s17, %s3385_s21   ;;  %v1733_v26 = vadd.f32 %v1732_v25, %v1726_v23  ;;  %v1875_v28 = vsub.f32 %v3269_v53, %v1867_v22  ;;  %v1877_v30 = vmul.f32 %v1868_v27, %v1868_v27  ;;  %v1878_v33 = vmul.f32 %v1869_v29, %v1869_v29 }
 0x192   : > { %v1728_v37 = vmul.f32 %v3331_v16, %v3331_v16  ;;  %v1879_v39 = vmul.f32 %v1870_v31, %v1870_v31  ;;  %v1729_v41 = vmul.f32 %v3334_v17, %v3334_v17  ;;  %v1880_v43 = vmul.f32 %v1871_v32, %v1871_v32  ;;  %s290_s18 = scalar_lea.vmem [#allocation6], %s3209_s9  ;;  %s3421_s15 = scalar_lea.hbm %s3503_s5, %s3309_s13 }
 0x193   : > { %v1734_v38 = vadd.f32 %v1733_v26, %v1727_v24  ;;  %v1885_v40 = vadd.f32 %v1878_v33, %v1877_v30  ;;  %v1730_v46 = vmul.f32 %v3337_v18, %v3337_v18  ;;  %v1881_v48 = vmul.f32 %v1872_v34, %v1872_v34  ;;  %s1974_s17 = sshll.u32 %s290_s18, 4  ;;  %s3509_s28 = scalar_lea.vmem [#allocation9], %s3209_s9  ;;  %s3423_s17 = int_to_ptr.vmem [resolvable:$true] %s1974_s17 }
 0x194   : > { %v1882_v51 = vmul.f32 %v1873_v35, %v1873_v35  ;;  %v1883_v9 = vmul.f32 %v1874_v36, %v1874_v36  ;;  %v1884_v55 = vmul.f32 %v1875_v28, %v1875_v28  ;;  %s3428_s29 = sshll.u32 %s3509_s28, 4  ;;  %s2770_s8 = scalar_lea.vmem %s3423_s17, 16  ;;  %s2001_s29 = int_to_ptr.vmem [resolvable:$true] %s3428_s29 }
 0x195   : > { %v1735_v42 = vadd.f32 %v1734_v38, %v1728_v37  ;;  %v1886_v45 = vadd.f32 %v1885_v40, %v1879_v39  ;;  %p2771_p11 = scmp.ne.s32.totalorder %s3423_s17, %s2770_s8  ;;  %s2875_s19 = smov [#allocation6]  }
 0x196   : > { %s2774_s16 = sshll.u32 %s2875_s19, 4  ;;  %s2775_s16 = int_to_ptr.vmem [resolvable:$false] %s2774_s16 }
 0x197   : > { %v1736_v47 = vadd.f32 %v1735_v42, %v1729_v41  ;;  %v1887_v49 = vadd.f32 %v1886_v45, %v1880_v43  ;;  %p2772_p12 = pnand %p2771_p11, %p2957_p5  ;;  %s2776_s14 = scalar_lea.vmem %s2775_s16, 32 }
 0x198   : > { %p2777_p0 = scmp.lt.s32.totalorder %s3423_s17, %s2775_s16  ;;  %p2778_p1 = scmp.lt.s32.totalorder %s2776_s14, %s2770_s8 }
 0x199   : > { %v1737_v50 = vadd.f32 %v1736_v47, %v1730_v46  ;;  %v1888_v52 = vadd.f32 %v1887_v49, %v1881_v48  ;;  %p2773_p13 = pneg %p2772_p12 }
 0x19a   : > { %p2779_p2 = por %p2778_p1, %p2777_p0 }
 0x19b   : > { %v1738_v53 = vrot.slane %v1737_v50, 4  ;;  %v1889_v54 = vadd.f32 %v1888_v52, %v1882_v51 }
 0x19c   : > { %p2780_p3 = pnand %p2779_p2, %p2773_p13 }
 0x19d   : > { %v1890_v56 = vadd.f32 %v1889_v54, %v1883_v9  ;;  %v1739_v57 = vadd.f32 %v1738_v53, %v1737_v50 }
 0x19f   : > { %v1891_v60 = vadd.f32 %v1890_v56, %v1884_v55  ;;  %v1740_v61 = vrot.slane %v1739_v57, 2 }
 0x1a1   : > { %v1892_v62 = vrot.slane %v1891_v60, 4  ;;  %v1741_v63 = vadd.f32 %v1740_v61, %v1739_v57 }
 0x1a3   : > { %v1893_v0 = vadd.f32 %v1892_v62, %v1891_v60  ;;  %v1742_v1 = vrot.slane %v1741_v63, 1 }
 0x1a5   : > { %v1894_v2 = vrot.slane %v1893_v0, 2  ;;  %v1743_v59 = vadd.f32 %v1742_v1, %v1741_v63 }
 0x1a7   : > { %1744 = vst [vmem:[%s290_s18] sm:$0x1] %v1743_v59  ;;  %v1895_v3 = vadd.f32 %v1894_v2, %v1893_v0 }
 0x1a8   : > { %2783 = shalt.err (!%p2780_p3)
}
 0x1a9   : > { %s2784_s18 = scalar_lea.hbm %s3421_s15, 16  ;;  %s2788_s19 = scalar_lea.hbm %s3503_s5, 32 }
 0x1aa   : > { %p2785_p4 = scmp.ne.s32.totalorder %s3421_s15, %s2784_s18  ;;  %p2789_p9 = scmp.lt.u32.totalorder %s3421_s15, %s3503_s5 }
 0x1ab   : > { %p2790_p10 = scmp.lt.u32.totalorder %s2788_s19, %s2784_s18  ;;  %p2792_p12 = scmp.lt.u32.totalorder %s2784_s18, %s3421_s15 }
 0x1ac   : > { %p2786_p7 = pnand %p2785_p4, %p2957_p5 }
 0x1ad   : > { %p2791_p11 = por %p2790_p10, %p2789_p9 }
 0x1ae   : > { %p2787_p8 = pneg %p2786_p7 }
 0x1af   : > { %p2793_p13 = por %p2792_p12, %p2791_p11 }
 0x1b1   : > { %p2794_p0 = pnand %p2793_p13, %p2787_p8 }
 0x1b3   : > { %2797 = shalt.err (!%p2794_p0)
}
 0x1b4   : > { %2599 = dma.vmem_to_hbm [thread:$0]  (%p2957_p5), %s3423_s17, 16, %s3421_s15, %s3341_s22   ;;  %v1896_v4 = vrot.slane %v1895_v3, 1 }
 0x1b5   : > { %s3456_s14 = scalar_lea.hbm %s3505_s7, %s3309_s13  ;;  %s3516_s18 = scalar_lea.vmem [#allocation9], %s3209_s9 }
 0x1b6   : > { %v1897_v58 = vadd.f32 %v1896_v4, %v1895_v3  ;;  %s2798_s20 = scalar_lea.vmem %s2001_s29, 16  ;;  %s2876_s23 = smov [#allocation9]  }
 0x1b7   : > { %p2799_p1 = scmp.ne.s32.totalorder %s2001_s29, %s2798_s20  ;;  %s2802_s19 = sshll.u32 %s2876_s23, 4  ;;  %s2803_s19 = int_to_ptr.vmem [resolvable:$false] %s2802_s19 }
 0x1b8   : > { %1898 = vst [vmem:[%s3516_s18] sm:$0x1] %v1897_v58  ;;  %s2804_s16 = scalar_lea.vmem %s2803_s19, 32  ;;  %p2805_p4 = scmp.lt.s32.totalorder %s2001_s29, %s2803_s19 }
 0x1b9   : > { %p2800_p2 = pnand %p2799_p1, %p2957_p5  ;;  %p2806_p7 = scmp.lt.s32.totalorder %s2804_s16, %s2798_s20 }
 0x1bb   : > { %p2801_p3 = pneg %p2800_p2  ;;  %p2807_p8 = por %p2806_p7, %p2805_p4 }
 0x1bd   : > { %p2808_p9 = pnand %p2807_p8, %p2801_p3 }
 0x1bf   : > { %2811 = shalt.err (!%p2808_p9)
}
 0x1c0   : > { %s2812_s9 = scalar_lea.hbm %s3456_s14, 16  ;;  %s2816_s17 = scalar_lea.hbm %s3505_s7, 32 }
 0x1c1   : > { %p2813_p10 = scmp.ne.s32.totalorder %s3456_s14, %s2812_s9  ;;  %p2817_p13 = scmp.lt.u32.totalorder %s3456_s14, %s3505_s7 }
 0x1c2   : > { %p2818_p0 = scmp.lt.u32.totalorder %s2816_s17, %s2812_s9  ;;  %p2820_p2 = scmp.lt.u32.totalorder %s2812_s9, %s3456_s14 }
 0x1c3   : > { %p2814_p11 = pnand %p2813_p10, %p2957_p5 }
 0x1c4   : > { %p2819_p1 = por %p2818_p0, %p2817_p13 }
 0x1c5   : > { %p2815_p12 = pneg %p2814_p11 }
 0x1c6   : > { %p2821_p3 = por %p2820_p2, %p2819_p1 }
 0x1c8   : > { %p2822_p4 = pnand %p2821_p3, %p2815_p12 }
 0x1ca   : > { %2825 = shalt.err (!%p2822_p4)
}
 0x1cb   : > { %2601 = dma.vmem_to_hbm [thread:$0]  (%p2957_p5), %s2001_s29, 16, %s3456_s14, %s3385_s21  }
 0x1cc PF: > { %p2623_p7 = scmp.ge.s32.totalorder %s2868_s27, 2  ;;  %s2012_s8 = sand.u32 1, %s2856_s24  }
 0x1cd   : > { %s2013_s18 = scalar_lea.sflag [#allocation3], %s2012_s8 }
 0x1ce   : > { %p2608_p8 = pnand %p2623_p7, %p2961_p6 }
 0x1d0   : > { %2843 = dma.done.wait (!%p2608_p8), %s2013_s18, 512  }
 0x1d1   : > { %2845 = vsyncadd (!%p2608_p8), %s2013_s18, 4294966784  ;;  %s3517_s20 = sadd.s32 4294967294, %s2868_s27  }
 0x1d2   : > { %s2021_s23 = sand.u32 1, %s3517_s20  }
 0x1d3   : > { %s2022_s19 = scalar_lea.sflag [#allocation5], %s2021_s23 }
 0x1d4   : > { %2847 = dma.done.wait (!%p2608_p8), %s2022_s19, 32  }
 0x1d5   : > { %2849 = vsyncadd (!%p2608_p8), %s2022_s19, 4294967264  ;;  %s2038_s11 = scalar_lea.sflag [#allocation8], %s2021_s23 }
 0x1d6   : > { %2851 = dma.done.wait (!%p2608_p8), %s2038_s11, 32  }
 0x1d7   : > { %2853 = vsyncadd (!%p2608_p8), %s2038_s11, 4294967264  ;;  %p24_p5 = scmp.ge.s32.totalorder %s2942_s30, 4   ;;  %s3518_s24 = smov %s2860_s25 }
 0x1d8   : > { %s3519_s25 = smov %s2864_s26  ;;  %s3520_s26 = smov %s2955_s10 }
 0x1d9   : > { %s3521_s27 = smov %s2942_s30  ;;  %26 = sbr.rel (!%p24_p5) target bundleno = 7 (0x7), region = 144 }
 0x1e0   :  { %2050 = vsyncpa [#allocation3], 1 }
 0x1e1   :  { %2052 = vsyncpa [#allocation3 + $0x1], 1 }
 0x1e2   :  { %2053 = vsyncpa [#allocation5], 1 }
 0x1e3   :  { %2055 = vsyncpa [#allocation5 + $0x1], 1 }
 0x1e4   :  { %2056 = vsyncpa [#allocation8], 1 }
 0x1e5   :  { %2058 = vsyncpa [#allocation8 + $0x1], 1 }

</bundles_post_ra>
